<compile_context>
chip_gen: v6e
topology: v6e:2x2x1
jax: 0.10.0
libtpu: 0.0.40
codegen_flags: <defaults>
</compile_context>

<pallas_src>
import jax
import jax.numpy as jnp
import numpy as np
from jax.experimental import pallas as pl
from jax.experimental.pallas import tpu as pltpu


def _round_up(x, m):
    return ((x + m - 1) // m) * m


def _grouped_gemm_kernel(tile_ref, bidx_ref, segs_ref, sege_ref, nact_ref,
                         a_ref, b_ref, cin_ref, out_ref, acc_ref):
    # grid = (N_tiles, work_items, K_tiles)
    w = pl.program_id(1)
    ki = pl.program_id(2)
    n_k = pl.num_programs(2)

    tm = a_ref.shape[0]

    active = w < nact_ref[0]
    t = tile_ref[w]            # m-tile index of this work item
    seg_s = segs_ref[w]        # segment [seg_s, seg_e) of this work item's expert
    seg_e = sege_ref[w]
    tile_s = t * tm

    @pl.when(jnp.logical_and(active, ki == 0))
    def _init():
        acc_ref[...] = jnp.zeros_like(acc_ref)

    nonempty_overlap = jnp.logical_and(
        seg_s < seg_e,
        jnp.logical_and(seg_s < tile_s + tm, seg_e > tile_s),
    )

    @pl.when(jnp.logical_and(active, nonempty_overlap))
    def _compute():
        # Unmasked MXU matmul; per-row masking is applied once to the (tm, tn)
        # result at write time (K/tn x less VPU work than masking the LHS).
        acc_ref[...] += jax.lax.dot_general(
            a_ref[...], b_ref[...],
            dimension_numbers=(((1,), (1,)), ((), ())),
            preferred_element_type=jnp.float32,
        )

    @pl.when(jnp.logical_and(active, ki == n_k - 1))
    def _write():
        row = tile_s + jax.lax.broadcasted_iota(jnp.int32, (tm, 1), 0)
        in_seg = jnp.logical_and(row >= seg_s, row < seg_e)
        # First work item for this output tile?  Work items for one tile are
        # consecutive along w and w resets to 0 at every ni step, so this is
        # exactly "the output block was freshly selected".
        prev_t = tile_ref[jnp.maximum(w - 1, 0)]
        first = jnp.logical_or(w == 0, prev_t != t)
        # First item seeds uncovered rows with cin; later items for the same
        # tile only overwrite their own segment's rows (out block stays
        # resident in VMEM across consecutive work items with the same tile).
        fallback = jnp.where(first, cin_ref[...].astype(out_ref.dtype), out_ref[...])
        out_ref[...] = jnp.where(in_seg, acc_ref[...].astype(out_ref.dtype), fallback)


def _make_work_metadata(seg_indptr, weight_indices, num_groups, m_tiles, tm):
    """Per-work-item metadata (tile id, weight row, segment bounds, #active)."""
    starts_all = seg_indptr[:-1]
    ends_all = seg_indptr[1:]
    nonempty = ends_all > starts_all

    # Put non-empty groups first (original order preserved) so the set of
    # groups overlapping any m-tile is a contiguous index range.
    order_key = jnp.where(nonempty, 0, num_groups) + jnp.arange(num_groups)
    perm = jnp.argsort(order_key)
    starts = starts_all[perm]
    ends = ends_all[perm]
    widx = weight_indices[perm]
    nnz = jnp.sum(nonempty.astype(jnp.int32))

    tile_lo = jnp.arange(m_tiles, dtype=jnp.int32) * tm
    tile_hi = tile_lo + tm
    gvalid = jnp.arange(num_groups, dtype=jnp.int32) < nnz
    # (m_tiles, num_groups) overlap matrix over non-empty groups only.
    ov = jnp.logical_and(
        jnp.logical_and(starts[None, :] < tile_hi[:, None],
                        ends[None, :] > tile_lo[:, None]),
        gvalid[None, :],
    )
    cnt = ov.sum(axis=1).astype(jnp.int32)            # experts overlapping each tile
    g_lo = jnp.argmax(ov, axis=1).astype(jnp.int32)   # first overlapping expert (0 if none)
    items = jnp.maximum(cnt, 1)                       # >=1 so every tile writes its output
    cum = jnp.cumsum(items)
    offset = cum - items
    num_active = cum[-1:].astype(jnp.int32)           # dynamic #work items, shape (1,)

    # Static upper bound on work items: m_tiles + num_groups.
    n_work = m_tiles + num_groups
    w_idx = jnp.arange(n_work, dtype=jnp.int32)
    tile_ids = jnp.minimum(jnp.searchsorted(cum, w_idx, side="right"),
                           m_tiles - 1).astype(jnp.int32)
    loc = jnp.minimum(w_idx - offset[tile_ids], items[tile_ids] - 1)  # pad repeats last item
    gidx = jnp.clip(g_lo[tile_ids] + loc, 0, num_groups - 1)

    seg_start_w = starts[gidx].astype(jnp.int32)
    seg_end_w = ends[gidx].astype(jnp.int32)
    b_block_w = widx[gidx].astype(jnp.int32)
    return tile_ids, b_block_w, seg_start_w, seg_end_w, num_active, n_work


def grouped_gemm_pallas(
    a,
    b,
    c,
    batch_size,
    weight_column_major,
    seg_indptr,
    weight_indices=None,
    use_fp8_w8a8=False,
    scale_a=None,
    scale_b=None,
    block_shape=None,
    c_dtype=None,
    *,
    tile_m=128,
    tile_n=None,
    tile_k=None,
):
    assert weight_column_major, "only weight_column_major=True is supported"
    assert not use_fp8_w8a8  # TODO(synk): fp8 w8a8 with scale_a/scale_b/block_shape not implemented
    assert seg_indptr is not None

    M, K = a.shape
    _, N, Kb = b.shape
    assert Kb == K
    num_groups = int(batch_size)
    assert seg_indptr.shape[0] == num_groups + 1

    out_dtype = c_dtype if c_dtype is not None else (c.dtype if c is not None else a.dtype)
    if c is None:
        c = jnp.zeros((M, N), dtype=out_dtype)

    if weight_indices is None:
        weight_indices = jnp.arange(num_groups, dtype=jnp.int32)
    seg_indptr = seg_indptr.astype(jnp.int32)
    weight_indices = weight_indices.astype(jnp.int32)

    # ---- tile selection -------------------------------------------------
    tm = max(8, min(int(tile_m), _round_up(M, 8)))            # multiple of 8
    if tile_n is None:
        tn = 256 if (N % 256 == 0 and N >= 256) else 128      # 256x256 MXU on v6e/v7x
    else:
        tn = int(tile_n)
    if tile_k is None:
        k_r = _round_up(K, 128)
        if k_r <= 2048:
            tk = k_r
        else:  # split K so double-buffered blocks stay well within v7x VMEM
            tk = next(cand for cand in (2048, 1024, 512, 256, 128) if k_r % cand == 0)
    else:
        tk = int(tile_k)

    M_pad = _round_up(M, tm)
    N_pad = _round_up(N, tn)
    K_pad = _round_up(K, tk)
    m_tiles = M_pad // tm

    a_p = a if (M_pad == M and K_pad == K) else jnp.pad(a, ((0, M_pad - M), (0, K_pad - K)))
    b_p = b if (N_pad == N and K_pad == K) else jnp.pad(b, ((0, 0), (0, N_pad - N), (0, K_pad - K)))
    c_p = c if (M_pad == M and N_pad == N) else jnp.pad(c, ((0, M_pad - M), (0, N_pad - N)))

    (tile_ids, b_block_w, seg_start_w, seg_end_w, num_active,
     n_work) = _make_work_metadata(seg_indptr, weight_indices, num_groups, m_tiles, tm)

    grid = (N_pad // tn, n_work, K_pad // tk)

    grid_spec = pltpu.PrefetchScalarGridSpec(
        num_scalar_prefetch=5,
        grid=grid,
        in_specs=[
            pl.BlockSpec((tm, tk),
                         lambda ni, w, ki, tiles, bidx, ss, se, na: (tiles[w], ki)),
            pl.BlockSpec((pl.Squeezed(), tn, tk),
                         lambda ni, w, ki, tiles, bidx, ss, se, na: (bidx[w], ni, ki)),
            pl.BlockSpec((tm, tn),
                         lambda ni, w, ki, tiles, bidx, ss, se, na: (tiles[w], ni)),
        ],
        out_specs=pl.BlockSpec((tm, tn),
                               lambda ni, w, ki, tiles, bidx, ss, se, na: (tiles[w], ni)),
        scratch_shapes=[pltpu.VMEM((tm, tn), jnp.float32)],
    )

    out = pl.pallas_call(
        _grouped_gemm_kernel,
        out_shape=jax.ShapeDtypeStruct((M_pad, N_pad), out_dtype),
        grid_spec=grid_spec,
        compiler_params=pltpu.CompilerParams(
            # N axis independent -> megacore-parallel on v7x; the work-item
            # axis carries output read-back and must stay serial.
            dimension_semantics=("parallel", "arbitrary", "arbitrary")),
    )(tile_ids, b_block_w, seg_start_w, seg_end_w, num_active, a_p, b_p, c_p)

    if M_pad != M or N_pad != N:
        out = out[:M, :N]
    return out


class GroupedGemmRunner:
    """JAX/Pallas analogue of sglang's GroupedGemmRunner (TPU, no flashinfer)."""

    def __init__(self, device=None, use_flashinfer: bool = False,
                 use_per_token_if_dynamic: bool = True):
        assert not use_flashinfer, "flashinfer path not supported on TPU"
        self.device = device
        self.use_flashinfer = use_flashinfer
        self.use_per_token_if_dynamic = use_per_token_if_dynamic

    def forward(self, a, b, c, batch_size, weight_column_major,
                seg_indptr=None, weight_indices=None, use_fp8_w8a8=False,
                scale_a=None, scale_b=None, block_shape=None, c_dtype=None):
        assert weight_column_major is True
        return grouped_gemm_pallas(
            a, b, c, batch_size, weight_column_major, seg_indptr,
            weight_indices, use_fp8_w8a8, scale_a, scale_b,
            block_shape=block_shape, c_dtype=c_dtype,
        )

    __call__ = forward


if __name__ == "__main__":
    key = jax.random.PRNGKey(0)
    k_a, k_b = jax.random.split(key)

    # Small MoE-style problem: M tokens (sorted by expert), E experts.
    # Segment layout exercises: empty expert, boundary inside a tile, a
    # segment crossing an m-tile boundary, and uncovered rows (keep c).
    M, K, N, E = 160, 256, 256, 4

    a = jax.random.normal(k_a, (M, K), dtype=jnp.float32).astype(jnp.bfloat16)
    # weight_column_major: b[e] is (N, K); output row = a_row @ b[e].T
    b = (jax.random.normal(k_b, (E, N, K), dtype=jnp.float32) * 0.1).astype(jnp.bfloat16)
    c = jnp.full((M, N), 7.0, dtype=jnp.bfloat16)

    seg_indptr = jnp.array([0, 56, 56, 130, 150], dtype=jnp.int32)
    weight_indices = jnp.array([1, 0, 3, 2], dtype=jnp.int32)

    runner = GroupedGemmRunner(device=None, use_flashinfer=False)
    out = runner(
        a, b, c,
        batch_size=E,
        weight_column_major=True,
        seg_indptr=seg_indptr,
        weight_indices=weight_indices,
    )
    out = jax.block_until_ready(out)

    # Pure-JAX/numpy reference.
    a32 = np.asarray(a, dtype=np.float32)
    b32 = np.asarray(b, dtype=np.float32)
    ref = np.asarray(c, dtype=np.float32).copy()
    seg_np = np.asarray(seg_indptr)
    widx_np = np.asarray(weight_indices)
    for e in range(E):
        s, t = int(seg_np[e]), int(seg_np[e + 1])
        if s < t:
            ref[s:t] = a32[s:t] @ b32[widx_np[e]].T

    np.testing.assert_allclose(
        np.asarray(out, dtype=np.float32), ref, rtol=2e-2, atol=2e-2
    )
    print("KERNEL_OK")
</pallas_src>

<mosaic_0001>
module attributes {stable_mosaic.version = 11 : i64} {
  func.func @_grouped_gemm_kernel(%arg0: i32, %arg1: i32, %arg2: i32, %arg3: memref<6xi32, #tpu.memory_space<smem>>, %arg4: memref<6xi32, #tpu.memory_space<smem>>, %arg5: memref<6xi32, #tpu.memory_space<smem>>, %arg6: memref<6xi32, #tpu.memory_space<smem>>, %arg7: memref<1xi32, #tpu.memory_space<smem>>, %arg8: memref<128x256xbf16, #tpu.memory_space<vmem>>, %arg9: memref<1x256x256xbf16, #tpu.memory_space<vmem>>, %arg10: memref<128x256xbf16, #tpu.memory_space<vmem>>, %arg11: memref<128x256xbf16, #tpu.memory_space<vmem>>, %arg12: memref<128x256xf32, #tpu.memory_space<vmem>>) attributes {dimension_semantics = [#tpu.dimension_semantics<parallel>, #tpu.dimension_semantics<arbitrary>, #tpu.dimension_semantics<arbitrary>], iteration_bounds = array<i64: 1, 6, 1>, scalar_prefetch = 5 : i64, scratch_operands = 1 : i64, tpu.core_type = #tpu.core_type<tc>, window_params = [{transform_indices = @transform_0, window_bounds = array<i64: 128, 256>}, {transform_indices = @transform_1, window_bounds = array<i64: 1, 256, 256>}, {transform_indices = @transform_2, window_bounds = array<i64: 128, 256>}, {transform_indices = @transform_3, window_bounds = array<i64: 128, 256>}]} {
    %c0 = arith.constant 0 : index
    %0 = memref.load %arg7[%c0] : memref<1xi32, #tpu.memory_space<smem>>
    %1 = arith.cmpi slt, %arg1, %0 : i32
    %2 = arith.index_cast %arg1 : i32 to index
    %3 = memref.load %arg3[%2] : memref<6xi32, #tpu.memory_space<smem>>
    %4 = arith.index_cast %arg1 : i32 to index
    %5 = memref.load %arg5[%4] : memref<6xi32, #tpu.memory_space<smem>>
    %6 = arith.index_cast %arg1 : i32 to index
    %7 = memref.load %arg6[%6] : memref<6xi32, #tpu.memory_space<smem>>
    %c128_i32 = arith.constant 128 : i32
    %8 = arith.muli %3, %c128_i32 : i32
    %c0_i32 = arith.constant 0 : i32
    %9 = arith.cmpi eq, %arg2, %c0_i32 : i32
    %10 = arith.andi %1, %9 : i1
    %11 = arith.extui %10 : i1 to i32
    %c0_i32_0 = arith.constant 0 : i32
    %12 = arith.cmpi ne, %11, %c0_i32_0 : i32
    scf.if %12 {
      %cst = arith.constant 0.000000e+00 : f32
      %26 = vector.broadcast %cst : f32 to vector<128x256xf32>
      %c0_5 = arith.constant 0 : index
      %c0_6 = arith.constant 0 : index
      %27 = vector.load %arg12[%c0_5, %c0_6] : memref<128x256xf32, #tpu.memory_space<vmem>>, vector<128x256xf32>
      tpu.vector_store %arg12[%c0_5, %c0_6], %26 {strides = array<i32>} : memref<128x256xf32, #tpu.memory_space<vmem>>, vector<128x256xf32>,
    } else {
    }
    %13 = arith.cmpi slt, %5, %7 : i32
    %c128_i32_1 = arith.constant 128 : i32
    %14 = arith.addi %8, %c128_i32_1 : i32
    %15 = arith.cmpi slt, %5, %14 : i32
    %16 = arith.cmpi sgt, %7, %8 : i32
    %17 = arith.andi %15, %16 : i1
    %18 = arith.andi %13, %17 : i1
    %19 = arith.andi %1, %18 : i1
    %20 = arith.extui %19 : i1 to i32
    %c0_i32_2 = arith.constant 0 : i32
    %21 = arith.cmpi ne, %20, %c0_i32_2 : i32
    scf.if %21 {
      %c0_5 = arith.constant 0 : index
      %c0_6 = arith.constant 0 : index
      %26 = vector.load %arg12[%c0_5, %c0_6] : memref<128x256xf32, #tpu.memory_space<vmem>>, vector<128x256xf32>
      %c0_7 = arith.constant 0 : index
      %c0_8 = arith.constant 0 : index
      %27 = vector.load %arg8[%c0_7, %c0_8] : memref<128x256xbf16, #tpu.memory_space<vmem>>, vector<128x256xbf16>
      %c0_9 = arith.constant 0 : index
      %c0_10 = arith.constant 0 : index
      %c0_11 = arith.constant 0 : index
      %28 = vector.load %arg9[%c0_9, %c0_10, %c0_11] : memref<1x256x256xbf16, #tpu.memory_space<vmem>>, vector<1x256x256xbf16>
      %29 = vector.shape_cast %28 : vector<1x256x256xbf16> to vector<256x256xbf16>
      %cst = arith.constant dense<0.000000e+00> : vector<128x256xf32>
      %30 = tpu.matmul %27, %29, %cst {dimension_numbers = #tpu.dot_dimension_numbers<[1], [1], [0], [0], [0, 0, 1, 0], [], []>} : vector<128x256xbf16>, vector<256x256xbf16>, vector<128x256xf32> -> vector<128x256xf32>
      %31 = arith.addf %26, %30 : vector<128x256xf32>
      %c0_12 = arith.constant 0 : index
      %c0_13 = arith.constant 0 : index
      %32 = vector.load %arg12[%c0_12, %c0_13] : memref<128x256xf32, #tpu.memory_space<vmem>>, vector<128x256xf32>
      tpu.vector_store %arg12[%c0_12, %c0_13], %31 {strides = array<i32>} : memref<128x256xf32, #tpu.memory_space<vmem>>, vector<128x256xf32>,
    } else {
    }
    %c0_i32_3 = arith.constant 0 : i32
    %22 = arith.cmpi eq, %arg2, %c0_i32_3 : i32
    %23 = arith.andi %1, %22 : i1
    %24 = arith.extui %23 : i1 to i32
    %c0_i32_4 = arith.constant 0 : i32
    %25 = arith.cmpi ne, %24, %c0_i32_4 : i32
    scf.if %25 {
      %26 = tpu.iota {dimensions = array<i32: 0>} : vector<128x1xi32>
      %27 = vector.broadcast %8 : i32 to vector<128x1xi32>
      %28 = arith.addi %27, %26 : vector<128x1xi32>
      %29 = vector.broadcast %5 : i32 to vector<128x1xi32>
      %30 = arith.cmpi sge, %28, %29 : vector<128x1xi32>
      %31 = vector.broadcast %7 : i32 to vector<128x1xi32>
      %32 = arith.cmpi slt, %28, %31 : vector<128x1xi32>
      %33 = arith.andi %30, %32 : vector<128x1xi1>
      %c1_i32 = arith.constant 1 : i32
      %34 = arith.subi %arg1, %c1_i32 : i32
      %c0_i32_5 = arith.constant 0 : i32
      %35 = arith.maxsi %34, %c0_i32_5 : i32
      %36 = arith.index_cast %35 : i32 to index
      %37 = memref.load %arg3[%36] : memref<6xi32, #tpu.memory_space<smem>>
      %c0_i32_6 = arith.constant 0 : i32
      %38 = arith.cmpi eq, %arg1, %c0_i32_6 : i32
      %39 = arith.cmpi ne, %37, %3 : i32
      %40 = arith.ori %38, %39 : i1
      %c0_7 = arith.constant 0 : index
      %c0_8 = arith.constant 0 : index
      %41 = vector.load %arg10[%c0_7, %c0_8] : memref<128x256xbf16, #tpu.memory_space<vmem>>, vector<128x256xbf16>
      %c0_9 = arith.constant 0 : index
      %c0_10 = arith.constant 0 : index
      %42 = vector.load %arg11[%c0_9, %c0_10] : memref<128x256xbf16, #tpu.memory_space<vmem>>, vector<128x256xbf16>
      %43 = arith.select %40, %41, %42 : vector<128x256xbf16>
      %c0_11 = arith.constant 0 : index
      %c0_12 = arith.constant 0 : index
      %44 = vector.load %arg12[%c0_11, %c0_12] : memref<128x256xf32, #tpu.memory_space<vmem>>, vector<128x256xf32>
      %45 = arith.truncf %44 : vector<128x256xf32> to vector<128x256xbf16>
      %46 = vector.shape_cast %33 : vector<128x1xi1> to vector<128x1xi1>
      %47 = vector.broadcast %46 : vector<128x1xi1> to vector<128x256xi1>
      %48 = arith.select %47, %45, %43 : vector<128x256xi1>, vector<128x256xbf16>
      %c0_13 = arith.constant 0 : index
      %c0_14 = arith.constant 0 : index
      %49 = vector.load %arg11[%c0_13, %c0_14] : memref<128x256xbf16, #tpu.memory_space<vmem>>, vector<128x256xbf16>
      tpu.vector_store %arg11[%c0_13, %c0_14], %48 {strides = array<i32>} : memref<128x256xbf16, #tpu.memory_space<vmem>>, vector<128x256xbf16>,
    } else {
    }
    return
  }
  func.func @transform_0(%arg0: i32, %arg1: i32, %arg2: i32, %arg3: memref<6xi32, #tpu.memory_space<smem>>, %arg4: memref<6xi32, #tpu.memory_space<smem>>, %arg5: memref<6xi32, #tpu.memory_space<smem>>, %arg6: memref<6xi32, #tpu.memory_space<smem>>, %arg7: memref<1xi32, #tpu.memory_space<smem>>) -> (i32, i32) {
    %0 = arith.index_cast %arg1 : i32 to index
    %1 = memref.load %arg3[%0] : memref<6xi32, #tpu.memory_space<smem>>
    %c0_i32 = arith.constant 0 : i32
    return %1, %arg2 : i32, i32
  }
  func.func @transform_1(%arg0: i32, %arg1: i32, %arg2: i32, %arg3: memref<6xi32, #tpu.memory_space<smem>>, %arg4: memref<6xi32, #tpu.memory_space<smem>>, %arg5: memref<6xi32, #tpu.memory_space<smem>>, %arg6: memref<6xi32, #tpu.memory_space<smem>>, %arg7: memref<1xi32, #tpu.memory_space<smem>>) -> (i32, i32, i32) {
    %0 = arith.index_cast %arg1 : i32 to index
    %1 = memref.load %arg4[%0] : memref<6xi32, #tpu.memory_space<smem>>
    %c0_i32 = arith.constant 0 : i32
    return %1, %arg0, %arg2 : i32, i32, i32
  }
  func.func @transform_2(%arg0: i32, %arg1: i32, %arg2: i32, %arg3: memref<6xi32, #tpu.memory_space<smem>>, %arg4: memref<6xi32, #tpu.memory_space<smem>>, %arg5: memref<6xi32, #tpu.memory_space<smem>>, %arg6: memref<6xi32, #tpu.memory_space<smem>>, %arg7: memref<1xi32, #tpu.memory_space<smem>>) -> (i32, i32) {
    %0 = arith.index_cast %arg1 : i32 to index
    %1 = memref.load %arg3[%0] : memref<6xi32, #tpu.memory_space<smem>>
    %c0_i32 = arith.constant 0 : i32
    return %1, %arg0 : i32, i32
  }
  func.func @transform_3(%arg0: i32, %arg1: i32, %arg2: i32, %arg3: memref<6xi32, #tpu.memory_space<smem>>, %arg4: memref<6xi32, #tpu.memory_space<smem>>, %arg5: memref<6xi32, #tpu.memory_space<smem>>, %arg6: memref<6xi32, #tpu.memory_space<smem>>, %arg7: memref<1xi32, #tpu.memory_space<smem>>) -> (i32, i32) {
    %0 = arith.index_cast %arg1 : i32 to index
    %1 = memref.load %arg3[%0] : memref<6xi32, #tpu.memory_space<smem>>
    %c0_i32 = arith.constant 0 : i32
    return %1, %arg0 : i32, i32
  }
}

</mosaic_0001>

<bundles_post_ra>
// kernel: tpu_custom_call.1
= control target key start
LH: loop header
LB: loop body
LE: loop exit
PB: predicated region body
PF: predicated region fallthrough
CT: control target
= control target key end

     0   :  { %s3290_s0 = inlined_call_operand.vmem [shape: s32[6], index: 0, kind: input, shape index: {}]   ;;  %s3291_s5 = inlined_call_operand.hbm [shape: bf16[256,256], index: 5, kind: input, shape index: {}]   ;;  %s3292_s6 = inlined_call_operand.hbm [shape: bf16[4,256,256], index: 6, kind: input, shape index: {}]   ;;  %s3293_s7 = inlined_call_operand.hbm [shape: bf16[256,256], index: 7, kind: input, shape index: {}]   ;;  %s3294_s8 = inlined_call_operand.hbm [shape: bf16[256,256], index: 8, kind: output, shape index: {}]   ;;  %s3295_s1 = inlined_call_operand.vmem [shape: s32[6], index: 1, kind: input, shape index: {}]   ;;  %s3296_s2 = inlined_call_operand.vmem [shape: s32[6], index: 2, kind: input, shape index: {}]   ;;  %s3297_s3 = inlined_call_operand.vmem [shape: s32[6], index: 3, kind: input, shape index: {}]   ;;  %s3298_s4 = inlined_call_operand.<no memory space> [shape: s32[1], index: 4, kind: input, shape index: {}]  }
   0x1   :  { %3325 = sst [smem:[#allocation39_spill]] %s3292_s6  ;;  %s13_s29 = sshll.u32 %s3290_s0, 4  ;;  %s14_s29 = int_to_ptr.vmem [resolvable:$true] %s13_s29 }
   0x2   :  { %3326 = sst [smem:[#allocation40_spill]] %s3294_s8  ;;  %s17_s10 = sshll.u32 %s3295_s1, 4  ;;  %s18_s10 = int_to_ptr.vmem [resolvable:$true] %s17_s10 }
   0x3   :  { %s1943_s11 = scalar_lea.vmem %s14_s29, 16  ;;  %p1948_p1 = scmp.lt.s32.totalorder %s14_s29, %s14_s29 }
   0x4   :  { %p1944_p0 = scmp.ne.s32.totalorder %s14_s29, %s1943_s11  ;;  %p1949_p2 = scmp.lt.s32.totalorder %s1943_s11, %s1943_s11 }
   0x6   :  { %p1950_p3 = por %p1949_p2, %p1948_p1 }
   0x8   :  { %p1951_p4 = pnand %p1950_p3, %p1944_p0 }
   0xa   :  { %1954 = shalt.err (!%p1951_p4)  }
   0xb   :  { %s2239_s12 = smov [#allocation4]   ;;  %s1955_s13 = scalar_lea.vmem %s18_s10, 16 }
   0xc   :  { %16 = dma.vmem_to_smem %s14_s29, 16, %s2239_s12, [#allocation3] }
   0xd   :  { %p1956_p5 = scmp.ne.s32.totalorder %s18_s10, %s1955_s13  ;;  %p1960_p6 = scmp.lt.s32.totalorder %s18_s10, %s18_s10 }
   0xe   :  { %p1961_p7 = scmp.lt.s32.totalorder %s1955_s13, %s1955_s13 }
  0x10   :  { %p1962_p8 = por %p1961_p7, %p1960_p6 }
  0x12   :  { %p1963_p9 = pnand %p1962_p8, %p1956_p5 }
  0x14   :  { %1966 = shalt.err (!%p1963_p9)  }
  0x15   :  { %s2240_s0 = smov [#allocation5]   ;;  %s21_s15 = sshll.u32 %s3296_s2, 4  ;;  %s22_s15 = int_to_ptr.vmem [resolvable:$true] %s21_s15 }
  0x16   :  { %20 = dma.vmem_to_smem %s18_s10, 16, %s2240_s0, [#allocation3] }
  0x17   :  { %s25_s18 = sshll.u32 %s3297_s3, 4  ;;  %s1967_s19 = scalar_lea.vmem %s22_s15, 16  ;;  %s26_s18 = int_to_ptr.vmem [resolvable:$true] %s25_s18 }
  0x18   :  { %p1968_p10 = scmp.ne.s32.totalorder %s22_s15, %s1967_s19  ;;  %p1972_p11 = scmp.lt.s32.totalorder %s22_s15, %s22_s15 }
  0x19   :  { %p1973_p12 = scmp.lt.s32.totalorder %s1967_s19, %s1967_s19 }
  0x1b   :  { %p1974_p13 = por %p1973_p12, %p1972_p11 }
  0x1d   :  { %p1975_p0 = pnand %p1974_p13, %p1968_p10 }
  0x1f   :  { %1978 = shalt.err (!%p1975_p0)  }
  0x20   :  { %s2241_s20 = smov [#allocation6]   ;;  %s1979_s21 = scalar_lea.vmem %s26_s18, 16 }
  0x21   :  { %24 = dma.vmem_to_smem %s22_s15, 16, %s2241_s20, [#allocation3] }
  0x22   :  { %p1980_p1 = scmp.ne.s32.totalorder %s26_s18, %s1979_s21  ;;  %p1984_p2 = scmp.lt.s32.totalorder %s26_s18, %s26_s18 }
  0x23   :  { %p1985_p3 = scmp.lt.s32.totalorder %s1979_s21, %s1979_s21 }
  0x25   :  { %p1986_p4 = por %p1985_p3, %p1984_p2 }
  0x27   :  { %p1987_p5 = pnand %p1986_p4, %p1980_p1 }
  0x29   :  { %1990 = shalt.err (!%p1987_p5)  }
  0x2a   :  { %s2242_s2 = smov [#allocation7]   ;;  %29 = sst [smem:[#allocation8]] %s3298_s4 }
  0x2b   :  { %28 = dma.vmem_to_smem %s26_s18, 16, %s2242_s2, [#allocation3] }
  0x2c   :  { %2161 = dma.done.wait [#allocation3], 64 }
  0x2d   :  { %2162 = vsyncadd [#allocation3], 4294967232 }
  0x2e   :  { %31 = sfence }
  0x2f   :  { %32 = vsyncpa [#allocation10], 0 }
  0x30   :  { %34 = vsyncpa [#allocation10 + $0x1], 0 }
  0x31   :  { %35 = vsyncpa [#allocation13], 0 }
  0x32   :  { %37 = vsyncpa [#allocation13 + $0x1], 0 }
  0x33   :  { %38 = vsyncpa [#allocation11], 0 }
  0x34   :  { %40 = vsyncpa [#allocation11 + $0x1], 0  ;;  %s2313_s23 = smov 0   ;;  %s2315_s24 = smov 0  }
  0x35   :  { %s2317_s25 = smov 0   ;;  %s2319_s26 = smov 0  }
  0x36   :  { %s2321_s27 = smov 0   ;;  %s2323_s4 = smov 0  }
  0x37   :  { %s2325_s28 = smov 0   ;;  %s2327_s29 = smov 0  }
  0x38   :  { %s2329_s30 = smov 0   ;;  %s2331_s9 = smov 0  }
  0x39   :  { %s2333_s10 = smov 0   ;;  %s2335_s11 = smov 0  }
  0x3a   :  { %s2337_s12 = smov 0   ;;  %s2339_s13 = smov 0  }
  0x3b   :  { %s2341_s0 = smov 0  }
  0x3c LB: > { %3327 = sst [smem:[#allocation28_spill]] %s2181_s23  ;;  %s2387_s1 = sadd.s32 4294967295, %s2237_s0   ;;  %s2237_s0 = sphi %s2341_s0, %s46_s0   ;;  %s2233_s13 = sphi %s2339_s13, %s3430_s13   ;;  %s2229_s12 = sphi %s2337_s12, %s3429_s12   ;;  %s2225_s11 = sphi %s2335_s11, %s3428_s11   ;;  %s2221_s10 = sphi %s2333_s10, %s3427_s10   ;;  %s2217_s9 = sphi %s2331_s9, %s3426_s9   ;;  %s2213_s30 = sphi %s2329_s30, %s3419_s30   ;;  %s2209_s29 = sphi %s2327_s29, %s3425_s29   ;;  %s2205_s28 = sphi %s2325_s28, %s3424_s28   ;;  %s2201_s4 = sphi %s2323_s4, %s3423_s4   ;;  %s2197_s27 = sphi %s2321_s27, %s3422_s27   ;;  %s2193_s26 = sphi %s2319_s26, %s3421_s26   ;;  %s2189_s25 = sphi %s2317_s25, %s3417_s25   ;;  %s2185_s24 = sphi %s2315_s24, %s3416_s24   ;;  %s2181_s23 = sphi %s2313_s23, %s3415_s23  }
  0x3d   : > { %3328 = sst [smem:[#allocation29_spill]] %s2185_s24  ;;  %s1547_s14 = sadd.s32 4294967294, %s2237_s0  }
  0x3e   : > { %3329 = sst [smem:[#allocation30_spill]] %s2189_s25  ;;  %s61_s15 = sadd.s32 1, %s2233_s13 }
  0x3f   : > { %3330 = sst [smem:[#allocation31_spill]] %s2213_s30  ;;  %p3313_p6 = scmp.eq.s32.totalorder %s2237_s0, 0 }
  0x40   : > { %3331 = sst [smem:[#allocation32_spill]] %s2229_s12  ;;  %p63_p7 = scmp.ge.s32.totalorder %s61_s15, 6 }
  0x41   : > { %p3314_p8 = scmp.eq.s32.totalorder %s2387_s1, 0  ;;  %s99_s16 = sld [smem:[#allocation5 + %s2233_s13]] }
  0x42   : > { %s108_s17 = sadd.s32 1, %s2213_s30  ;;  %s3432_s15 = smov (%p63_p7, %s61_s15), 0 }
  0x43   : > { %3332 = sst [smem:[#allocation33_spill]] %s3432_s15  ;;  %p115_p9 = scmp.ne.s32.totalorder %s2213_s30, %s2209_s29 }
  0x44   : > { %p121_p10 = scmp.ne.s32.totalorder %s2209_s29, %s2205_s28  ;;  %s100_s18 = sld [smem:[#allocation5 + %s3432_s15]] }
  0x45   : > { %s168_s19 = sadd.s32 1, %s2189_s25  ;;  %p2404_p11 = por %p115_p9, %p3313_p6 }
  0x46   : > { %p2410_p12 = por %p121_p10, %p3314_p8  ;;  %s161_s2 = sld [smem:[#allocation4 + %s2233_s13]] }
  0x47   : > { %p178_p13 = scmp.ne.s32.totalorder %s2189_s25, %s2185_s24  ;;  %s162_s3 = sld [smem:[#allocation4 + %s3432_s15]] }
  0x48   : > { %s3334_s21 = scalar_select %p2410_p12, 1, 0 }
  0x49   : > { %p179_p0 = scmp.eq.s32.totalorder %s2387_s1, 5  ;;  %p184_p1 = scmp.ne.s32.totalorder %s2185_s24, %s2181_s23 }
  0x4a   : > { %3335 = sst [smem:[#allocation34_spill]] %s3334_s21  ;;  %p185_p2 = scmp.eq.s32.totalorder %s1547_s14, 5 }
  0x4b   : > { %p2421_p3 = por %p179_p0, %p178_p13  ;;  %s101_s28 = ssub.s32 %s99_s16, %s100_s18 }
  0x4c   : > { %p2425_p4 = por %p185_p2, %p184_p1  ;;  %p106_p5 = scmp.eq.s32.totalorder %s101_s28, 0 }
  0x4d   : > { %s3336_s22 = scalar_select %p2421_p3, 1, 0 }
  0x4e   : > { %s3338_s8 = scalar_select %p2425_p4, 1, 0 }
  0x4f   : > { %3337 = sst [smem:[#allocation35_spill]] %s3336_s22  ;;  %p3312_p7 = scmp.lt.s32.totalorder %s2237_s0, 6 }
  0x50   : > { %3339 = sst [smem:[#allocation36_spill]] %s3338_s8  ;;  %s163_s23 = ssub.s32 %s161_s2, %s162_s3 }
  0x51   : > { %s2431_s12 = scalar_select %p106_p5, %s2213_s30, %s108_s17  }
  0x52   : > { %s230_s14 = sand.u32 1, %s2237_s0   ;;  %p166_p9 = scmp.eq.s32.totalorder %s163_s23, 0 }
  0x53   : > { %3340 = sst [smem:[#allocation37_spill]] %s2431_s12  ;;  %s232_s24 = sand.u32 1, %s2213_s30  }
  0x54   : > { %p2439_p10 = pnand %p3312_p7, %p2404_p11  ;;  %s1554_s18 = sshll.u32 %s232_s24, 8 }
  0x55   : > { %s2444_s16 = scalar_select %p166_p9, %s2189_s25, %s168_s19  }
  0x56   : > { %p1561_p13 = scmp.ge.s32.totalorder %s2237_s0, 1  ;;  %s234_s23 = scalar_lea.vmem [#allocation12], %s1554_s18 }
  0x57   : > { %3342 = sst [smem:[#allocation38_spill]] %s2444_s16  ;;  %s247_s2 = sshll.u32 %s234_s23, 4  ;;  %s2457_s2 = int_to_ptr.vmem [resolvable:$true] %s247_s2 }
  0x58   : > { %s1706_s28 = scalar_select %p2404_p11, [#allocation5], [#allocation17] }
  0x59   : > { %s1707_s17 = scalar_select %p2404_p11, %s2233_s13, 0 }
  0x5a   : > { %s3434_s28 = smov (!%p3312_p7, %s1706_s28), [#allocation21]  ;;  %p280_p0 = scmp.lt.s32.totalorder %s2237_s0, 7 }
  0x5b   : > { %s3436_s17 = smov (!%p3312_p7, %s1707_s17), 0  ;;  %s2464_s24 = sld [smem:[#allocation4 + %s2233_s13]] }
  0x5c   : > { %s235_s3 = sld [smem:[%s3434_s28 + %s3436_s17]]  ;;  %p2459_p1 = pnand %p1561_p13, %p280_p0 }
  0x5d   : > { %s2467_s20 = sld [smem:[#allocation4 + %s3432_s15]]  ;;  %s2474_s18 = scalar_lea.sflag [#allocation13], %s230_s14 }
  0x5e   : > { %s3343_s19 = scalar_select %p2459_p1, 1, 0 }
  0x5f   : > { %s3344_s6 = sld [smem:[#allocation39_spill]]  ;;  %p1993_p2 = pneg %p2439_p10 }
  0x62   : > { %s1665_s12 = sshll.u32 %s235_s3, 12 }
  0x65   : > { %s2472_s25 = scalar_lea.hbm %s3344_s6, %s1665_s12  ;;  %s1996_s3 = scalar_lea.hbm %s3344_s6, 16384 }
  0x66   : > { %s1991_s28 = scalar_lea.hbm %s2472_s25, 4096  ;;  %p1997_p13 = scmp.lt.s32.totalorder %s2472_s25, %s3344_s6 }
  0x67   : > { %p1992_p11 = scmp.ne.s32.totalorder %s2472_s25, %s1991_s28  ;;  %p1998_p0 = scmp.lt.s32.totalorder %s1996_s3, %s1991_s28 }
  0x69   : > { %p1994_p5 = pnand %p1993_p2, %p1992_p11  ;;  %p1999_p7 = por %p1998_p0, %p1997_p13 }
  0x6b   : > { %p1995_p9 = pneg %p1994_p5 }
  0x6d   : > { %p2000_p6 = pnand %p1999_p7, %p1995_p9 }
  0x6f   : > { %2003 = shalt.err (!%p2000_p6)
}
  0x70   : > { %s2004_s30 = scalar_lea.vmem %s2457_s2, 4096  ;;  %s2243_s12 = smov [#allocation12]  }
  0x71   : > { %p2005_p8 = scmp.ne.s32.totalorder %s2457_s2, %s2004_s30  ;;  %s2009_s14 = sshll.u32 %s2243_s12, 4  ;;  %s2010_s14 = int_to_ptr.vmem [resolvable:$false] %s2009_s14 }
  0x72   : > { %s2011_s16 = scalar_lea.vmem %s2010_s14, 8192  ;;  %p2012_p5 = scmp.lt.s32.totalorder %s2457_s2, %s2010_s14 }
  0x73   : > { %p2007_p4 = pnand %p2005_p8, %p1993_p2  ;;  %p2013_p3 = scmp.lt.s32.totalorder %s2011_s16, %s2004_s30 }
  0x75   : > { %p2008_p11 = pneg %p2007_p4  ;;  %p2014_p12 = por %p2013_p3, %p2012_p5 }
  0x77   : > { %p2015_p1 = pnand %p2014_p12, %p2008_p11 }
  0x79   : > { %2018 = shalt.err (!%p2015_p1)
}
  0x7a   : > { %s3317_s8 = smov 128   ;;  %s3319_s21 = smov 8  }
  0x7b   : > { %1729 = dma.hbm_to_vmem [thread:$0]  (!%p2439_p10), %s2472_s25, 4096, %s2457_s2, %s2474_s18, %s3317_s8, %s3317_s8, %s3319_s21  }
  0x7c   : > { %p83_p6 = scmp.ne.s32.totalorder %s2225_s11, %s2221_s10  ;;  %p89_p8 = scmp.ne.s32.totalorder %s2221_s10, %s2217_s9 }
  0x7d   : > { %s76_s28 = sadd.s32 1, %s2225_s11  ;;  %s205_s17 = sand.u32 1, %s2225_s11  }
  0x7e   : > { %p3345_p12 = scmp.eq.s32.totalorder %s2387_s1, 0  ;;  %s71_s3 = ssub.s32 %s2464_s24, %s2467_s20 }
  0x7f   : > { %p3347_p4 = scmp.eq.s32.totalorder %s2237_s0, 0  ;;  %p74_p1 = scmp.eq.s32.totalorder %s71_s3, 0 }
  0x80   : > { %p2506_p3 = por %p3345_p12, %p89_p8  ;;  %s1550_s25 = sshll.u32 %s205_s17, 7 }
  0x81   : > { %p85_p7 = por %p3347_p4, %p83_p6  ;;  %p3348_p10 = scmp.lt.s32.totalorder %s2237_s0, 6 }
  0x82   : > { %s3346_s23 = scalar_select %p2506_p3, 1, 0 }
  0x83   : > { %p2516_p2 = pnand %p3348_p10, %p85_p7  ;;  %p3350_p9 = pmov %p3348_p10 }
  0x84   : > { %s2521_s22 = scalar_select %p74_p1, %s2225_s11, %s76_s28  }
  0x85   : > { %s1703_s2 = scalar_select %p85_p7, [#allocation4], [#allocation16] }
  0x86   : > { %s1704_s30 = scalar_select %p85_p7, %s2233_s13, 0 }
  0x87   : > { %s3438_s2 = smov (!%p3350_p9, %s1703_s2), [#allocation20]  ;;  %p3351_p13 = pmov %p3350_p9 }
  0x88   : > { %s209_s20 = scalar_lea.vmem [#allocation9], %s1550_s25  ;;  %s2529_s14 = sld [smem:[#allocation4 + %s2233_s13]] }
  0x89   : > { %s3440_s30 = smov (!%p3351_p13, %s1704_s30), 0  ;;  %s220_s12 = sshll.u32 %s209_s20, 4  ;;  %s2531_s12 = int_to_ptr.vmem [resolvable:$true] %s220_s12 }
  0x8a   : > { %s210_s24 = sld [smem:[%s3438_s2 + %s3440_s30]]  ;;  %p145_p0 = scmp.ne.s32.totalorder %s2201_s4, %s2197_s27 }
  0x8b   : > { %s2534_s16 = sld [smem:[#allocation4 + %s3432_s15]]  ;;  %p3352_p5 = pmov %p3347_p4 }
  0x8c   : > { %s2552_s2 = scalar_lea.sflag [#allocation10], %s205_s17  ;;  %p2021_p12 = pneg %p2516_p2 }
  0x8d   : > { %p2548_p6 = por %p145_p0, %p3352_p5  ;;  %s2024_s21 = scalar_lea.hbm %s3291_s5, 4096 }
  0x8f   : > { %s3353_s25 = scalar_select %p2548_p6, 1, 0 }
  0x90   : > { %s1664_s28 = sshll.u32 %s210_s24, 11 }
  0x91   : > { %s2544_s6 = scalar_lea.hbm %s3291_s5, %s1664_s28 }
  0x92   : > { %s2019_s30 = scalar_lea.hbm %s2544_s6, 2048  ;;  %p2025_p1 = scmp.lt.s32.totalorder %s2544_s6, %s3291_s5 }
  0x93   : > { %p2020_p8 = scmp.ne.s32.totalorder %s2544_s6, %s2019_s30  ;;  %p2026_p10 = scmp.lt.s32.totalorder %s2024_s21, %s2019_s30 }
  0x95   : > { %p2022_p4 = pnand %p2021_p12, %p2020_p8  ;;  %p2027_p9 = por %p2026_p10, %p2025_p1 }
  0x97   : > { %p2023_p7 = pneg %p2022_p4 }
  0x99   : > { %p2028_p13 = pnand %p2027_p9, %p2023_p7 }
  0x9b   : > { %2031 = shalt.err (!%p2028_p13)
}
  0x9c   : > { %s2032_s17 = scalar_lea.vmem %s2531_s12, 2048  ;;  %s2246_s3 = smov [#allocation9]  }
  0x9d   : > { %p2033_p0 = scmp.ne.s32.totalorder %s2531_s12, %s2032_s17  ;;  %s2037_s15 = sshll.u32 %s2246_s3, 4  ;;  %s2038_s15 = int_to_ptr.vmem [resolvable:$false] %s2037_s15 }
  0x9e   : > { %s2039_s24 = scalar_lea.vmem %s2038_s15, 4096  ;;  %p2040_p4 = scmp.lt.s32.totalorder %s2531_s12, %s2038_s15 }
  0x9f   : > { %p2035_p5 = pnand %p2033_p0, %p2021_p12  ;;  %p2041_p11 = scmp.lt.s32.totalorder %s2039_s24, %s2032_s17 }
  0xa1   : > { %p2036_p8 = pneg %p2035_p5  ;;  %p2042_p3 = por %p2041_p11, %p2040_p4 }
  0xa3   : > { %p2043_p6 = pnand %p2042_p3, %p2036_p8 }
  0xa5   : > { %2046 = shalt.err (!%p2043_p6)
}
  0xa6   : > { %s3354_s30 = smov 8   ;;  %s3355_s8 = smov 128  }
  0xa7   : > { %1724 = dma.hbm_to_vmem [thread:$0]  (!%p2516_p2), %s2544_s6, 2048, %s2531_s12, %s2552_s2, %s3355_s8, %s3355_s8, %s3354_s30  }
  0xa8   : > { %p3356_p3 = scmp.eq.s32.totalorder %s2387_s1, 0  ;;  %p3357_p11 = scmp.ne.s32.totalorder %s2197_s27, %s2193_s26 }
  0xa9   : > { %s133_s9 = ssub.s32 %s2529_s14, %s2534_s16  ;;  %s138_s3 = sadd.s32 1, %s2201_s4 }
  0xaa   : > { %p2581_p6 = por %p3357_p11, %p3356_p3  ;;  %p136_p12 = scmp.eq.s32.totalorder %s133_s9, 0 }
  0xab   : > { %s3359_s21 = sand.u32 1, %s2201_s4   ;;  %p3360_p7 = scmp.ne.s32.totalorder %s3353_s25, 0 }
  0xac   : > { %s3358_s15 = scalar_select %p2581_p6, 1, 0 }
  0xad   : > { %s1557_s20 = sshll.u32 %s3359_s21, 7  ;;  %p3361_p1 = scmp.lt.s32.totalorder %s2237_s0, 6 }
  0xae   : > { %s1709_s28 = scalar_select %p3360_p7, [#allocation4], [#allocation18] }
  0xaf   : > { %s2593_s17 = scalar_select %p136_p12, %s2201_s4, %s138_s3  }
  0xb0   : > { %s1710_s24 = scalar_select %p3360_p7, %s2233_s13, 0 }
  0xb1   : > { %s3442_s28 = smov (!%p3361_p1, %s1709_s28), [#allocation22]  ;;  %p3362_p2 = pmov %p3361_p1 }
  0xb2   : > { %p3363_p10 = pmov %p3361_p1  ;;  %s261_s12 = scalar_lea.vmem [#allocation14], %s1557_s20 }
  0xb3   : > { %s3444_s24 = smov (!%p3362_p2, %s1710_s24), 0  ;;  %s272_s14 = sshll.u32 %s261_s12, 4  ;;  %s2610_s14 = int_to_ptr.vmem [resolvable:$true] %s272_s14 }
  0xb4   : > { %p2606_p9 = pnand %p3363_p10, %p3360_p7  ;;  %s262_s26 = sld [smem:[%s3442_s28 + %s3444_s24]] }
  0xb5   : > { %s2052_s28 = scalar_lea.hbm %s3293_s7, 4096 }
  0xb6   : > { %p2049_p0 = pneg %p2606_p9 }
  0xba   : > { %s1667_s16 = sshll.u32 %s262_s26, 11 }
  0xbb   : > { %s2615_s3 = scalar_lea.hbm %s3293_s7, %s1667_s16 }
  0xbc   : > { %s2047_s25 = scalar_lea.hbm %s2615_s3, 2048  ;;  %p2053_p4 = scmp.lt.s32.totalorder %s2615_s3, %s3293_s7 }
  0xbd   : > { %p2048_p13 = scmp.ne.s32.totalorder %s2615_s3, %s2047_s25  ;;  %p2054_p3 = scmp.lt.s32.totalorder %s2052_s28, %s2047_s25 }
  0xbf   : > { %p2050_p5 = pnand %p2049_p0, %p2048_p13  ;;  %p2055_p11 = por %p2054_p3, %p2053_p4 }
  0xc1   : > { %p2051_p8 = pneg %p2050_p5 }
  0xc3   : > { %p2056_p12 = pnand %p2055_p11, %p2051_p8 }
  0xc5   : > { %2059 = shalt.err (!%p2056_p12)
}
  0xc6   : > { %s2060_s12 = scalar_lea.vmem %s2610_s14, 2048  ;;  %s2247_s16 = smov [#allocation14]  }
  0xc7   : > { %p2061_p7 = scmp.ne.s32.totalorder %s2610_s14, %s2060_s12  ;;  %s2065_s2 = sshll.u32 %s2247_s16, 4  ;;  %s2066_s2 = int_to_ptr.vmem [resolvable:$false] %s2065_s2 }
  0xc8   : > { %s2067_s9 = scalar_lea.vmem %s2066_s2, 4096  ;;  %p2068_p10 = scmp.lt.s32.totalorder %s2610_s14, %s2066_s2 }
  0xc9   : > { %p2063_p1 = pnand %p2061_p7, %p2049_p0  ;;  %p2069_p13 = scmp.lt.s32.totalorder %s2067_s9, %s2060_s12 }
  0xcb   : > { %p2064_p2 = pneg %p2063_p1  ;;  %p2070_p5 = por %p2069_p13, %p2068_p10 }
  0xcd   : > { %p2071_p6 = pnand %p2070_p5, %p2064_p2 }
  0xcf   : > { %2074 = shalt.err (!%p2071_p6)
}
  0xd0   : > { %1734 = dma.hbm_to_vmem [thread:$0]  (!%p2606_p9), %s2615_s3, 2048, %s2610_s14, %s2474_s18, %s3355_s8, %s3355_s8, %s3354_s30  }
  0xd1   : > { %p3365_p0 = scmp.ne.s32.totalorder %s3343_s19, 0 }
  0xd2   : > { %s286_s25 = sand.u32 (!%p3365_p0), 1, %s2221_s10   ;;  %p3366_p6 = scmp.ne.s32.totalorder (!%p3365_p0), %s3346_s23, 0 }
  0xd3   : > { %284 = sbr.rel (%p3365_p0) target bundleno = 721 (0x2d1), region = 32  ;;  %s1562_s21 = sshll.u32 (!%p3365_p0), %s286_s25, 7 }
  0xd4   : > { %s287_s20 = scalar_lea.sflag (!%p3365_p0), [#allocation10], %s286_s25  ;;  %s2642_s28 = scalar_lea.vmem (!%p3365_p0), [#allocation9], %s1562_s21 }
  0xd8   : > { %2164 = dma.done.wait (%p3366_p6), %s287_s20, 2048  }
  0xd9   : > { %2166 = vsyncadd (%p3366_p6), %s287_s20, 4294965248  ;;  %s3367_s6 = sld [smem:[#allocation34_spill]]  ;;  %s295_s24 = sand.u32 1, %s2387_s1  }
  0xda   : > { %s297_s18 = sand.u32 1, %s2209_s29   ;;  %s296_s19 = scalar_lea.sflag [#allocation13], %s295_s24 }
  0xdb   : > { %s1563_s30 = sshll.u32 %s297_s18, 8 }
  0xdc   : > { %s2650_s8 = scalar_lea.vmem [#allocation12], %s1563_s30 }
  0xdf   : > { %p3368_p9 = scmp.ne.s32.totalorder %s3367_s6, 0 }
  0xe1   : > { %2168 = dma.done.wait (%p3368_p9), %s296_s19, 4096  }
  0xe2   : > { %2170 = vsyncadd (%p3368_p9), %s296_s19, 4294963200  ;;  %s306_s14 = sand.u32 1, %s2197_s27   ;;  %p3369_p8 = scmp.ne.s32.totalorder %s3358_s15, 0 }
  0xe3   : > { %s1564_s3 = sshll.u32 %s306_s14, 7 }
  0xe4   : > { %s2657_s23 = scalar_lea.vmem [#allocation14], %s1564_s3 }
  0xe5   : > { %2172 = dma.done.wait (%p3369_p8), %s296_s19, 2048  }
  0xe6   : > { %2174 = vsyncadd (%p3369_p8), %s296_s19, 4294965248  ;;  %s3370_s1 = sld [smem:[#allocation29_spill]] }
  0xe7   : > { %s3371_s26 = sld [smem:[#allocation32_spill]] }
  0xe8   : > { %s2664_s16 = sld [smem:[#allocation8]] }
  0xec   : > { %s338_s12 = sand.u32 1, %s3370_s1  }
  0xed   : > { %s1565_s2 = sshll.u32 %s338_s12, 7  ;;  %s2669_s9 = sld [smem:[#allocation4 + %s3371_s26]] }
  0xee   : > { %s2672_s25 = sld [smem:[#allocation6 + %s3371_s26]]  ;;  %p356_p4 = scmp.lt.s32.totalorder %s3371_s26, %s2664_s16 }
  0xef   : > { %s2675_s21 = sld [smem:[#allocation7 + %s3371_s26]]  ;;  %s2682_s20 = scalar_lea.vmem [#allocation15], %s1565_s2  ;;  %v2248_v0 = vmov (%p356_p4), 0.0  }
  0xf0   : > { %365 = sbr.rel (!%p356_p4) target bundleno = 256 (0x100), region = 48  ;;  %366 = vst [vmem:[#allocation2 + $0xb0] sm:$0xff] (%p356_p4), %v2248_v0  ;;  %367 = vst [vmem:[#allocation2] sm:$0xff] (%p356_p4), %v2248_v0 }
  0xf1   : > { %368 = vst [vmem:[#allocation2 + $0xd8] sm:$0xff] (%p356_p4), %v2248_v0  ;;  %369 = vst [vmem:[#allocation2 + $0x18] sm:$0xff] (%p356_p4), %v2248_v0 }
  0xf2   : > { %370 = vst [vmem:[#allocation2 + $0x50] sm:$0xff] (%p356_p4), %v2248_v0  ;;  %371 = vst [vmem:[#allocation2 + $0x68] sm:$0xff] (%p356_p4), %v2248_v0 }
  0xf3   : > { %s2680_s15 = sshll.u32 %s2669_s9, 7  ;;  %372 = vst [vmem:[#allocation2 + $0x30] sm:$0xff] (%p356_p4), %v2248_v0  ;;  %373 = vst [vmem:[#allocation2 + $0x48] sm:$0xff] (%p356_p4), %v2248_v0 }
  0xf4   : > { %374 = vst [vmem:[#allocation2 + $0x80] sm:$0xff] (%p356_p4), %v2248_v0  ;;  %375 = vst [vmem:[#allocation2 + $0x88] sm:$0xff] (%p356_p4), %v2248_v0 }
  0xf5   : > { %376 = vst [vmem:[#allocation2 + $0xe8] sm:$0xff] %v2248_v0  ;;  %377 = vst [vmem:[#allocation2 + $0xb8] sm:$0xff] %v2248_v0 }
  0xf6   : > { %378 = vst [vmem:[#allocation2 + $0x60] sm:$0xff] %v2248_v0  ;;  %379 = vst [vmem:[#allocation2 + $0xf0] sm:$0xff] %v2248_v0 }
  0xf7   : > { %380 = vst [vmem:[#allocation2 + $0x8] sm:$0xff] %v2248_v0  ;;  %381 = vst [vmem:[#allocation2 + $0x78] sm:$0xff] %v2248_v0 }
  0xf8   : > { %382 = vst [vmem:[#allocation2 + $0x38] sm:$0xff] %v2248_v0  ;;  %383 = vst [vmem:[#allocation2 + $0x58] sm:$0xff] %v2248_v0 }
  0xf9   : > { %384 = vst [vmem:[#allocation2 + $0x40] sm:$0xff] %v2248_v0  ;;  %385 = vst [vmem:[#allocation2 + $0xc8] sm:$0xff] %v2248_v0 }
  0xfa   : > { %386 = vst [vmem:[#allocation2 + $0xe0] sm:$0xff] %v2248_v0  ;;  %387 = vst [vmem:[#allocation2 + $0x90] sm:$0xff] %v2248_v0 }
  0xfb   : > { %388 = vst [vmem:[#allocation2 + $0x70] sm:$0xff] %v2248_v0  ;;  %389 = vst [vmem:[#allocation2 + $0xc0] sm:$0xff] %v2248_v0 }
  0xfc   : > { %390 = vst [vmem:[#allocation2 + $0xa8] sm:$0xff] %v2248_v0  ;;  %391 = vst [vmem:[#allocation2 + $0xd0] sm:$0xff] %v2248_v0 }
  0xfd   : > { %392 = vst [vmem:[#allocation2 + $0x10] sm:$0xff] %v2248_v0  ;;  %393 = vst [vmem:[#allocation2 + $0x28] sm:$0xff] %v2248_v0 }
  0xfe   : > { %394 = vst [vmem:[#allocation2 + $0xa0] sm:$0xff] %v2248_v0  ;;  %395 = vst [vmem:[#allocation2 + $0xf8] sm:$0xff] %v2248_v0 }
  0xff   : > { %396 = vst [vmem:[#allocation2 + $0x20] sm:$0xff] %v2248_v0  ;;  %397 = vst [vmem:[#allocation2 + $0x98] sm:$0xff] %v2248_v0 }
 0x100 PF: > { %s399_s24 = sadd.s32 128, %s2680_s15  ;;  %p401_p11 = scmp.gt.s32.totalorder %s2675_s21, %s2680_s15 }
 0x101   : > { %p400_p3 = scmp.lt.s32.totalorder %s2672_s25, %s399_s24  ;;  %p398_p12 = scmp.lt.s32.totalorder %s2672_s25, %s2675_s21 }
 0x103   : > { %p402_p7 = pnand %p401_p11, %p400_p3 }
 0x105   : > { %p403_p1 = pneg %p402_p7 }
 0x107   : > { %p404_p2 = pnand %p403_p1, %p398_p12 }
 0x109   : > { %p405_p10 = pneg %p404_p2 }
 0x10b   : > { %p406_p13 = pnand %p405_p10, %p356_p4 }
 0x10d   : > { %409 = sbr.rel (%p406_p13) target bundleno = 629 (0x275), region = 52 }
 0x112   : > { %v1871_v1 = vld [vmem:[%s2650_s8 + $0x74] ss:$8 sps:$4 sm:$0xff]   ;;  %v1873_v2 = vld [vmem:[%s2650_s8 + $0x70] ss:$8 sps:$4 sm:$0xff]   ;;  %v1874_v3 = vld [vmem:[%s2650_s8 + $0x64] ss:$8 sps:$4 sm:$0xff]  }
 0x113   : > { %730 = vmatprep.subr.bf16.mxu0 %v1871_v1  ;;  %1671 = vmatprep.subr.bf16.mxu1 %v1871_v1  ;;  %v1876_v4 = vld [vmem:[%s2650_s8 + $0x60] ss:$8 sps:$4 sm:$0xff]   ;;  %v1877_v5 = vld [vmem:[%s2650_s8 + $0x54] ss:$8 sps:$4 sm:$0xff]   ;;  %v1879_v6 = vld [vmem:[%s2650_s8 + $0x50] ss:$8 sps:$4 sm:$0xff]  }
 0x114   : > { %731 = vmatpush1.bf16.xpose.msra.mxu0 %v1873_v2  ;;  %1687 = vmatpush1.bf16.xpose.msra.mxu1 %v1873_v2  ;;  %v1880_v7 = vld [vmem:[%s2650_s8 + $0x44] ss:$8 sps:$4 sm:$0xff]   ;;  %v1882_v9 = vld [vmem:[%s2650_s8 + $0x40] ss:$8 sps:$4 sm:$0xff]   ;;  %v1883_v11 = vld [vmem:[%s2650_s8 + $0x34] ss:$8 sps:$4 sm:$0xff]  }
 0x115   : > { %732 = vmatprep.subr.bf16.mxu0 %v1874_v3  ;;  %1672 = vmatprep.subr.bf16.mxu1 %v1874_v3  ;;  %v1921_v8 = vld [vmem:[%s2642_s28 + $0x4] ss:$8 sps:$4 sm:$0xff]   ;;  %v1885_v12 = vld [vmem:[%s2650_s8 + $0x30] ss:$8 sps:$4 sm:$0xff]   ;;  %v1888_v14 = vld [vmem:[%s2650_s8 + $0x20] ss:$8 sps:$4 sm:$0xff]  }
 0x116   : > { %v1924_v10 = vld [vmem:[%s2642_s28 + $0x44] ss:$8 sps:$4 sm:$0xff]   ;;  %762 = vmatprep.mubr.bf16.mxu0 %v1921_v8  ;;  %v1889_v15 = vld [vmem:[%s2650_s8 + $0x14] ss:$8 sps:$4 sm:$0xff]   ;;  %v1891_v16 = vld [vmem:[%s2650_s8 + $0x10] ss:$8 sps:$4 sm:$0xff]  }
 0x117   : > { %802 = vmatprep.mubr.bf16.mxu1 %v1924_v10  ;;  %v1886_v13 = vld [vmem:[%s2650_s8 + $0x24] ss:$8 sps:$4 sm:$0xff]   ;;  %v1894_v18 = vld [vmem:[%s2650_s8] ss:$8 sps:$4 sm:$0xff]   ;;  %v1895_v19 = vld [vmem:[%s2650_s8 + $0xf4] ss:$8 sps:$4 sm:$0xff]  }
 0x118   : > { %v1892_v17 = vld [vmem:[%s2650_s8 + $0x4] ss:$8 sps:$4 sm:$0xff]   ;;  %v1897_v20 = vld [vmem:[%s2650_s8 + $0xf0] ss:$8 sps:$4 sm:$0xff]   ;;  %v1900_v22 = vld [vmem:[%s2650_s8 + $0xe0] ss:$8 sps:$4 sm:$0xff]  }
 0x119   : > { %v1898_v21 = vld [vmem:[%s2650_s8 + $0xe4] ss:$8 sps:$4 sm:$0xff]   ;;  %v1901_v23 = vld [vmem:[%s2650_s8 + $0xd4] ss:$8 sps:$4 sm:$0xff]   ;;  %v1903_v24 = vld [vmem:[%s2650_s8 + $0xd0] ss:$8 sps:$4 sm:$0xff]  }
 0x11a   : > { %v1904_v25 = vld [vmem:[%s2650_s8 + $0xc4] ss:$8 sps:$4 sm:$0xff]   ;;  %v1906_v26 = vld [vmem:[%s2650_s8 + $0xc0] ss:$8 sps:$4 sm:$0xff]   ;;  %v1907_v27 = vld [vmem:[%s2650_s8 + $0xb4] ss:$8 sps:$4 sm:$0xff]  }
 0x11b   : > { %v1909_v28 = vld [vmem:[%s2650_s8 + $0xb0] ss:$8 sps:$4 sm:$0xff]   ;;  %v1910_v29 = vld [vmem:[%s2650_s8 + $0xa4] ss:$8 sps:$4 sm:$0xff]   ;;  %v1912_v30 = vld [vmem:[%s2650_s8 + $0xa0] ss:$8 sps:$4 sm:$0xff]  }
 0x11c   : > { %733 = vmatpush1.bf16.xpose.msra.mxu0 %v1876_v4  ;;  %1688 = vmatpush1.bf16.xpose.msra.mxu1 %v1876_v4  ;;  %v1913_v31 = vld [vmem:[%s2650_s8 + $0x94] ss:$8 sps:$4 sm:$0xff]   ;;  %v1915_v32 = vld [vmem:[%s2650_s8 + $0x90] ss:$8 sps:$4 sm:$0xff]   ;;  %v1916_v33 = vld [vmem:[%s2650_s8 + $0x84] ss:$8 sps:$4 sm:$0xff]  }
 0x11d   : > { %734 = vmatprep.subr.bf16.mxu0 %v1877_v5  ;;  %1673 = vmatprep.subr.bf16.mxu1 %v1877_v5  ;;  %v1918_v34 = vld [vmem:[%s2650_s8 + $0x80] ss:$8 sps:$4 sm:$0xff]   ;;  %v1925_v37 = vld [vmem:[%s2642_s28 + $0x14] ss:$8 sps:$4 sm:$0xff]   ;;  %v1929_v39 = vld [vmem:[%s2642_s28 + $0x10] ss:$8 sps:$4 sm:$0xff]  }
 0x11e   : > { %v1919_v35 = vld [vmem:[%s2642_s28] ss:$8 sps:$4 sm:$0xff]   ;;  %v1927_v38 = vld [vmem:[%s2642_s28 + $0x54] ss:$8 sps:$4 sm:$0xff]   ;;  %v1930_v40 = vld [vmem:[%s2642_s28 + $0x50] ss:$8 sps:$4 sm:$0xff]  }
 0x11f   : > { %v1922_v36 = vld [vmem:[%s2642_s28 + $0x40] ss:$8 sps:$4 sm:$0xff]   ;;  %v1931_v41 = vld [vmem:[%s2642_s28 + $0x24] ss:$8 sps:$4 sm:$0xff]   ;;  %v1937_v45 = vld [vmem:[%s2642_s28 + $0x34] ss:$8 sps:$4 sm:$0xff]  }
 0x120   : > { %v1933_v42 = vld [vmem:[%s2642_s28 + $0x64] ss:$8 sps:$4 sm:$0xff]   ;;  %v1935_v43 = vld [vmem:[%s2642_s28 + $0x20] ss:$8 sps:$4 sm:$0xff]   ;;  %v1939_v46 = vld [vmem:[%s2642_s28 + $0x74] ss:$8 sps:$4 sm:$0xff]  }
 0x121   : > { %v1936_v44 = vld [vmem:[%s2642_s28 + $0x60] ss:$8 sps:$4 sm:$0xff]   ;;  %v1941_v47 = vld [vmem:[%s2642_s28 + $0x30] ss:$8 sps:$4 sm:$0xff]  }
 0x122   : > { %v1942_v48 = vld [vmem:[%s2642_s28 + $0x70] ss:$8 sps:$4 sm:$0xff]   ;;  %v411_v53 = vld [vmem:[#allocation2] sm:$0xff]  ;;  %v429_v2 = vld [vmem:[#allocation2 + $0xc8] sm:$0xff] }
 0x123   : > { %v410_v49 = vld [vmem:[#allocation2 + $0xb0] sm:$0xff]  ;;  %v426_v50 = vld [vmem:[#allocation2 + $0x38] sm:$0xff]  ;;  %v428_v60 = vld [vmem:[#allocation2 + $0x40] sm:$0xff] }
 0x124   : > { %735 = vmatpush1.bf16.xpose.msra.mxu0 %v1879_v6  ;;  %1689 = vmatpush1.bf16.xpose.msra.mxu1 %v1879_v6  ;;  %v427_v54 = vld [vmem:[#allocation2 + $0x58] sm:$0xff]  ;;  %v430_v8 = vld [vmem:[#allocation2 + $0xe0] sm:$0xff] }
 0x125   : > { %736 = vmatprep.subr.bf16.mxu0 %v1880_v7  ;;  %1674 = vmatprep.subr.bf16.mxu1 %v1880_v7  ;;  %v412_v59 = vld [vmem:[#allocation2 + $0xd8] sm:$0xff]  ;;  %v414_v7 = vld [vmem:[#allocation2 + $0x50] sm:$0xff] }
 0x126   : > { %v413_v1 = vld [vmem:[#allocation2 + $0x18] sm:$0xff] }
 0x12c   : > { %737 = vmatpush1.bf16.xpose.msra.mxu0 %v1882_v9  ;;  %1690 = vmatpush1.bf16.xpose.msra.mxu1 %v1882_v9 }
 0x12d   : > { %738 = vmatprep.subr.bf16.mxu0 %v1883_v11  ;;  %1675 = vmatprep.subr.bf16.mxu1 %v1883_v11 }
 0x134   : > { %739 = vmatpush1.bf16.xpose.msra.mxu0 %v1885_v12  ;;  %1691 = vmatpush1.bf16.xpose.msra.mxu1 %v1885_v12 }
 0x135   : > { %740 = vmatprep.subr.bf16.mxu0 %v1886_v13  ;;  %1676 = vmatprep.subr.bf16.mxu1 %v1886_v13  ;;  %v415_v13 = vld [vmem:[#allocation2 + $0x68] sm:$0xff] }
 0x13c   : > { %741 = vmatpush1.bf16.xpose.msra.mxu0 %v1888_v14  ;;  %1692 = vmatpush1.bf16.xpose.msra.mxu1 %v1888_v14  ;;  %v431_v14 = vld [vmem:[#allocation2 + $0x90] sm:$0xff] }
 0x13d   : > { %742 = vmatprep.subr.bf16.mxu0 %v1889_v15  ;;  %1677 = vmatprep.subr.bf16.mxu1 %v1889_v15 }
 0x144   : > { %743 = vmatpush1.bf16.xpose.msra.mxu0 %v1891_v16  ;;  %1693 = vmatpush1.bf16.xpose.msra.mxu1 %v1891_v16 }
 0x145   : > { %744 = vmatprep.subr.bf16.mxu0 %v1892_v17  ;;  %1678 = vmatprep.subr.bf16.mxu1 %v1892_v17 }
 0x14c   : > { %745 = vmatpush1.bf16.xpose.msra.mxu0 %v1894_v18  ;;  %1694 = vmatpush1.bf16.xpose.msra.mxu1 %v1894_v18 }
 0x14d   : > { %746 = vmatprep.subr.bf16.mxu0 %v1895_v19  ;;  %1679 = vmatprep.subr.bf16.mxu1 %v1895_v19  ;;  %v416_v19 = vld [vmem:[#allocation2 + $0x30] sm:$0xff] }
 0x154   : > { %747 = vmatpush2.bf16.xpose.msra.mxu0 %v1897_v20  ;;  %1695 = vmatpush2.bf16.xpose.msra.mxu1 %v1897_v20  ;;  %v432_v20 = vld [vmem:[#allocation2 + $0x70] sm:$0xff] }
 0x155   : > { %748 = vmatprep.subr.bf16.mxu0 %v1898_v21  ;;  %1680 = vmatprep.subr.bf16.mxu1 %v1898_v21 }
 0x15c   : > { %749 = vmatpush2.bf16.xpose.msra.mxu0 %v1900_v22  ;;  %1696 = vmatpush2.bf16.xpose.msra.mxu1 %v1900_v22 }
 0x15d   : > { %750 = vmatprep.subr.bf16.mxu0 %v1901_v23  ;;  %1681 = vmatprep.subr.bf16.mxu1 %v1901_v23 }
 0x164   : > { %751 = vmatpush2.bf16.xpose.msra.mxu0 %v1903_v24  ;;  %1697 = vmatpush2.bf16.xpose.msra.mxu1 %v1903_v24 }
 0x165   : > { %752 = vmatprep.subr.bf16.mxu0 %v1904_v25  ;;  %1682 = vmatprep.subr.bf16.mxu1 %v1904_v25  ;;  %v417_v25 = vld [vmem:[#allocation2 + $0x48] sm:$0xff] }
 0x16c   : > { %753 = vmatpush2.bf16.xpose.msra.mxu0 %v1906_v26  ;;  %1698 = vmatpush2.bf16.xpose.msra.mxu1 %v1906_v26  ;;  %v433_v26 = vld [vmem:[#allocation2 + $0xc0] sm:$0xff] }
 0x16d   : > { %754 = vmatprep.subr.bf16.mxu0 %v1907_v27  ;;  %1683 = vmatprep.subr.bf16.mxu1 %v1907_v27 }
 0x174   : > { %755 = vmatpush2.bf16.xpose.msra.mxu0 %v1909_v28  ;;  %1699 = vmatpush2.bf16.xpose.msra.mxu1 %v1909_v28 }
 0x175   : > { %756 = vmatprep.subr.bf16.mxu0 %v1910_v29  ;;  %1684 = vmatprep.subr.bf16.mxu1 %v1910_v29 }
 0x17c   : > { %757 = vmatpush2.bf16.xpose.msra.mxu0 %v1912_v30  ;;  %1700 = vmatpush2.bf16.xpose.msra.mxu1 %v1912_v30 }
 0x17d   : > { %758 = vmatprep.subr.bf16.mxu0 %v1913_v31  ;;  %1685 = vmatprep.subr.bf16.mxu1 %v1913_v31  ;;  %v418_v31 = vld [vmem:[#allocation2 + $0x80] sm:$0xff] }
 0x184   : > { %759 = vmatpush2.bf16.xpose.msra.mxu0 %v1915_v32  ;;  %1701 = vmatpush2.bf16.xpose.msra.mxu1 %v1915_v32  ;;  %v434_v32 = vld [vmem:[#allocation2 + $0xa8] sm:$0xff] }
 0x185   : > { %760 = vmatprep.subr.bf16.mxu0 %v1916_v33  ;;  %1686 = vmatprep.subr.bf16.mxu1 %v1916_v33 }
 0x18c   : > { %761 = vmatpush2.bf16.xpose.msra.mxu0 %v1918_v34  ;;  %1702 = vmatpush2.bf16.xpose.msra.mxu1 %v1918_v34 }
 0x193   : > { %763 = vmatmul.mubr.bf16.vlgmr.msra.gmra.mxu0 %v1919_v35  ;;  %803 = vmatmul.mubr.bf16.vlgmr.msra.gmra.mxu1 %v1922_v36 }
 0x194   : > { %772 = vmatprep.mubr.bf16.mxu0 %v1925_v37  ;;  %812 = vmatprep.mubr.bf16.mxu1 %v1927_v38  ;;  %v419_v37 = vld [vmem:[#allocation2 + $0x88] sm:$0xff]  ;;  %v435_v38 = vld [vmem:[#allocation2 + $0xd0] sm:$0xff] }
 0x19b   : > { %773 = vmatmul.mubr.bf16.gmra.mxu0 %v1929_v39  ;;  %813 = vmatmul.mubr.bf16.gmra.mxu1 %v1930_v40 }
 0x19c   : > { %782 = vmatprep.mubr.bf16.mxu0 %v1931_v41  ;;  %822 = vmatprep.mubr.bf16.mxu1 %v1933_v42 }
 0x1a3   : > { %783 = vmatmul.mubr.bf16.gmra.mxu0 %v1935_v43  ;;  %823 = vmatmul.mubr.bf16.gmra.mxu1 %v1936_v44  ;;  %v420_v43 = vld [vmem:[#allocation2 + $0xe8] sm:$0xff]  ;;  %v436_v44 = vld [vmem:[#allocation2 + $0x10] sm:$0xff] }
 0x1a4   : > { %792 = vmatprep.mubr.bf16.mxu0 %v1937_v45  ;;  %832 = vmatprep.mubr.bf16.mxu1 %v1939_v46 }
 0x1ab   : > { %793 = vmatmul.mubr.bf16.gmra.mxu0 %v1941_v47  ;;  %833 = vmatmul.mubr.bf16.gmra.mxu1 %v1942_v48 }
 0x253   : > { %v764_v51 = vpop.f32.mrf.mxu0  ;;  %v804_v52 = vpop.f32.mrf.mxu1 }
 0x254   : > { %v843_v55 = vadd.f32 %v764_v51, %v410_v49  ;;  %v859_v56 = vadd.f32 %v804_v52, %v426_v50  ;;  %v421_v49 = vld [vmem:[#allocation2 + $0xb8] sm:$0xff]  ;;  %v437_v50 = vld [vmem:[#allocation2 + $0x28] sm:$0xff] }
 0x255   : > { %v766_v57 = vpop.f32.mrf.mxu0  ;;  %v806_v58 = vpop.f32.mrf.mxu1 }
 0x256   : > { %875 = vst [vmem:[#allocation2 + $0xb0] sm:$0xff] %v843_v55  ;;  %891 = vst [vmem:[#allocation2 + $0x38] sm:$0xff] %v859_v56  ;;  %v844_v61 = vadd.f32 %v766_v57, %v411_v53  ;;  %v860_v62 = vadd.f32 %v806_v58, %v427_v54  ;;  %v422_v55 = vld [vmem:[#allocation2 + $0x60] sm:$0xff] }
 0x257   : > { %v768_v63 = vpop.f32.mrf.mxu0  ;;  %v808_v0 = vpop.f32.mrf.mxu1  ;;  %v438_v56 = vld [vmem:[#allocation2 + $0xa0] sm:$0xff] }
 0x258   : > { %876 = vst [vmem:[#allocation2] sm:$0xff] %v844_v61  ;;  %892 = vst [vmem:[#allocation2 + $0x58] sm:$0xff] %v860_v62  ;;  %v845_v3 = vadd.f32 %v768_v63, %v412_v59  ;;  %v861_v4 = vadd.f32 %v808_v0, %v428_v60  ;;  %v423_v61 = vld [vmem:[#allocation2 + $0xf0] sm:$0xff]  ;;  %v439_v62 = vld [vmem:[#allocation2 + $0xf8] sm:$0xff] }
 0x259   : > { %v770_v5 = vpop.f32.mrf.mxu0  ;;  %v810_v6 = vpop.f32.mrf.mxu1 }
 0x25a   : > { %877 = vst [vmem:[#allocation2 + $0xd8] sm:$0xff] %v845_v3  ;;  %893 = vst [vmem:[#allocation2 + $0x40] sm:$0xff] %v861_v4  ;;  %v846_v9 = vadd.f32 %v770_v5, %v413_v1  ;;  %v862_v10 = vadd.f32 %v810_v6, %v429_v2  ;;  %v424_v3 = vld [vmem:[#allocation2 + $0x8] sm:$0xff]  ;;  %v440_v4 = vld [vmem:[#allocation2 + $0x20] sm:$0xff] }
 0x25b   : > { %v774_v11 = vpop.f32.mrf.mxu0  ;;  %v814_v12 = vpop.f32.mrf.mxu1 }
 0x25c   : > { %878 = vst [vmem:[#allocation2 + $0x18] sm:$0xff] %v846_v9  ;;  %894 = vst [vmem:[#allocation2 + $0xc8] sm:$0xff] %v862_v10  ;;  %v847_v15 = vadd.f32 %v774_v11, %v414_v7  ;;  %v863_v16 = vadd.f32 %v814_v12, %v430_v8  ;;  %v425_v9 = vld [vmem:[#allocation2 + $0x78] sm:$0xff] }
 0x25d   : > { %v776_v17 = vpop.f32.mrf.mxu0  ;;  %v816_v18 = vpop.f32.mrf.mxu1  ;;  %v441_v10 = vld [vmem:[#allocation2 + $0x98] sm:$0xff] }
 0x25e   : > { %879 = vst [vmem:[#allocation2 + $0x50] sm:$0xff] %v847_v15  ;;  %895 = vst [vmem:[#allocation2 + $0xe0] sm:$0xff] %v863_v16  ;;  %v848_v21 = vadd.f32 %v776_v17, %v415_v13  ;;  %v864_v22 = vadd.f32 %v816_v18, %v431_v14 }
 0x25f   : > { %v778_v23 = vpop.f32.mrf.mxu0  ;;  %v818_v24 = vpop.f32.mrf.mxu1 }
 0x260   : > { %880 = vst [vmem:[#allocation2 + $0x68] sm:$0xff] %v848_v21  ;;  %896 = vst [vmem:[#allocation2 + $0x90] sm:$0xff] %v864_v22  ;;  %v849_v27 = vadd.f32 %v778_v23, %v416_v19  ;;  %v865_v28 = vadd.f32 %v818_v24, %v432_v20 }
 0x261   : > { %v780_v29 = vpop.f32.mrf.mxu0  ;;  %v820_v30 = vpop.f32.mrf.mxu1 }
 0x262   : > { %881 = vst [vmem:[#allocation2 + $0x30] sm:$0xff] %v849_v27  ;;  %897 = vst [vmem:[#allocation2 + $0x70] sm:$0xff] %v865_v28  ;;  %v850_v33 = vadd.f32 %v780_v29, %v417_v25  ;;  %v866_v34 = vadd.f32 %v820_v30, %v433_v26 }
 0x263   : > { %v784_v35 = vpop.f32.mrf.mxu0  ;;  %v824_v36 = vpop.f32.mrf.mxu1 }
 0x264   : > { %882 = vst [vmem:[#allocation2 + $0x48] sm:$0xff] %v850_v33  ;;  %898 = vst [vmem:[#allocation2 + $0xc0] sm:$0xff] %v866_v34  ;;  %v851_v39 = vadd.f32 %v784_v35, %v418_v31  ;;  %v867_v40 = vadd.f32 %v824_v36, %v434_v32 }
 0x265   : > { %v786_v41 = vpop.f32.mrf.mxu0  ;;  %v826_v42 = vpop.f32.mrf.mxu1 }
 0x266   : > { %883 = vst [vmem:[#allocation2 + $0x80] sm:$0xff] %v851_v39  ;;  %899 = vst [vmem:[#allocation2 + $0xa8] sm:$0xff] %v867_v40  ;;  %v852_v45 = vadd.f32 %v786_v41, %v419_v37  ;;  %v868_v46 = vadd.f32 %v826_v42, %v435_v38 }
 0x267   : > { %v788_v47 = vpop.f32.mrf.mxu0  ;;  %v828_v48 = vpop.f32.mrf.mxu1 }
 0x268   : > { %884 = vst [vmem:[#allocation2 + $0x88] sm:$0xff] %v852_v45  ;;  %900 = vst [vmem:[#allocation2 + $0xd0] sm:$0xff] %v868_v46  ;;  %v853_v51 = vadd.f32 %v788_v47, %v420_v43  ;;  %v869_v52 = vadd.f32 %v828_v48, %v436_v44 }
 0x269   : > { %v790_v53 = vpop.f32.mrf.mxu0  ;;  %v830_v54 = vpop.f32.mrf.mxu1 }
 0x26a   : > { %885 = vst [vmem:[#allocation2 + $0xe8] sm:$0xff] %v853_v51  ;;  %901 = vst [vmem:[#allocation2 + $0x10] sm:$0xff] %v869_v52  ;;  %v854_v57 = vadd.f32 %v790_v53, %v421_v49  ;;  %v870_v58 = vadd.f32 %v830_v54, %v437_v50 }
 0x26b   : > { %v794_v59 = vpop.f32.mrf.mxu0  ;;  %v834_v60 = vpop.f32.mrf.mxu1 }
 0x26c   : > { %886 = vst [vmem:[#allocation2 + $0xb8] sm:$0xff] %v854_v57  ;;  %902 = vst [vmem:[#allocation2 + $0x28] sm:$0xff] %v870_v58  ;;  %v855_v63 = vadd.f32 %v794_v59, %v422_v55  ;;  %v871_v0 = vadd.f32 %v834_v60, %v438_v56 }
 0x26d   : > { %v796_v1 = vpop.f32.mrf.mxu0  ;;  %v836_v2 = vpop.f32.mrf.mxu1 }
 0x26e   : > { %887 = vst [vmem:[#allocation2 + $0x60] sm:$0xff] %v855_v63  ;;  %903 = vst [vmem:[#allocation2 + $0xa0] sm:$0xff] %v871_v0  ;;  %v856_v5 = vadd.f32 %v796_v1, %v423_v61  ;;  %v872_v6 = vadd.f32 %v836_v2, %v439_v62 }
 0x26f   : > { %v798_v7 = vpop.f32.mrf.mxu0  ;;  %v838_v8 = vpop.f32.mrf.mxu1 }
 0x270   : > { %888 = vst [vmem:[#allocation2 + $0xf0] sm:$0xff] %v856_v5  ;;  %904 = vst [vmem:[#allocation2 + $0xf8] sm:$0xff] %v872_v6  ;;  %v857_v11 = vadd.f32 %v798_v7, %v424_v3  ;;  %v873_v12 = vadd.f32 %v838_v8, %v440_v4 }
 0x271   : > { %v800_v13 = vpop.f32.mrf.mxu0  ;;  %v840_v14 = vpop.f32.mrf.mxu1 }
 0x272   : > { %889 = vst [vmem:[#allocation2 + $0x8] sm:$0xff] %v857_v11  ;;  %905 = vst [vmem:[#allocation2 + $0x20] sm:$0xff] %v873_v12  ;;  %v858_v15 = vadd.f32 %v800_v13, %v425_v9  ;;  %v874_v16 = vadd.f32 %v840_v14, %v441_v10 }
 0x274   : > { %890 = vst [vmem:[#allocation2 + $0x78] sm:$0xff] %v858_v15  ;;  %906 = vst [vmem:[#allocation2 + $0x98] sm:$0xff] %v874_v16 }
 0x275 PF: > { %908 = sbr.rel (!%p356_p4) target bundleno = 690 (0x2b2), region = 56  ;;  %v909_v17 = vlaneseq (%p356_p4)  ;;  %s3374_s18 = sld [smem:[#allocation32_spill]] (%p356_p4)  ;;  %v2748_v18 = vld [vmem:[#allocation2 + $0xb0] sm:$0xff] (%p356_p4)  ;;  %v2751_v19 = vstv (%p356_p4), %s2680_s15  ;;  %v2755_v21 = vld [vmem:[#allocation2] sm:$0xff] (%p356_p4)  ;;  %v2757_v22 = vld [vmem:[#allocation2 + $0xd8] sm:$0xff] (%p356_p4)  ;;  %v2762_v24 = vstv (%p356_p4), %s2672_s25  ;;  %v2765_v25 = vstv (%p356_p4), %s2675_s21 }
 0x276   : > { %v2759_v23 = vld [vmem:[#allocation2 + $0x18] sm:$0xff] (%p356_p4)  ;;  %v1083_v26 = vpack.c.bf16 (%p356_p4), %v2757_v22, %v2748_v18  ;;  %v2774_v31 = vld [vmem:[#allocation2 + $0x50] sm:$0xff] (%p356_p4)  ;;  %v2776_v32 = vld [vmem:[#allocation2 + $0x68] sm:$0xff] (%p356_p4)  ;;  %v2249_v50 = vmov (%p356_p4), 0  }
 0x277   : > { %v2753_v20 = vshrl.u32 (%p356_p4), %v909_v17, 7  ;;  %v2778_v33 = vld [vmem:[#allocation2 + $0x30] sm:$0xff] (%p356_p4)  ;;  %v1084_v34 = vpack.c.bf16 (%p356_p4), %v2759_v23, %v2755_v21  ;;  %v2784_v35 = vld [vmem:[#allocation2 + $0x48] sm:$0xff] (%p356_p4)  ;;  %v2805_v46 = vld [vmem:[#allocation2 + $0x80] sm:$0xff] (%p356_p4) }
 0x278   : > { %v1085_v36 = vpack.c.bf16 (%p356_p4), %v2778_v33, %v2774_v31  ;;  %v1086_v43 = vpack.c.bf16 (%p356_p4), %v2784_v35, %v2776_v32  ;;  %v2807_v47 = vld [vmem:[#allocation2 + $0xe8] sm:$0xff] (%p356_p4)  ;;  %v2818_v49 = vld [vmem:[#allocation2 + $0xb8] sm:$0xff] (%p356_p4)  ;;  %v2832_v53 = vld [vmem:[#allocation2 + $0x60] sm:$0xff] (%p356_p4) }
 0x279   : > { %v911_v27 = vadd.s32 (%p356_p4), 8, %v2753_v20  ;;  %v927_v28 = vadd.s32 (%p356_p4), %v2751_v19, %v2753_v20  ;;  %v912_v29 = vadd.s32 (%p356_p4), 16, %v2753_v20  ;;  %v913_v30 = vadd.s32 (%p356_p4), 24, %v2753_v20  ;;  %v2816_v48 = vld [vmem:[#allocation2 + $0x88] sm:$0xff] (%p356_p4)  ;;  %v2849_v59 = vld [vmem:[#allocation2 + $0xf0] sm:$0xff] (%p356_p4)  ;;  %v1000_v7 = vld [vmem:[%s2657_s23] sm:$0xff] (%p356_p4) }
 0x27a   : > { %v914_v37 = vadd.s32 32, %v2753_v20  ;;  %v915_v38 = vadd.s32 40, %v2753_v20  ;;  %v1087_v52 = vpack.c.bf16 %v2807_v47, %v2805_v46  ;;  %v1088_v56 = vpack.c.bf16 %v2818_v49, %v2816_v48  ;;  %v2851_v60 = vld [vmem:[#allocation2 + $0x8] sm:$0xff]  ;;  %v1016_v9 = vld [vmem:[%s2682_s20] sm:$0xff]  ;;  %v1002_v12 = vld [vmem:[%s2657_s23 + $0x10] sm:$0xff] }
 0x27b   : > { %s1616_s30 = sadd.s32 4294967295, %s3374_s18  ;;  %v928_v39 = vadd.s32 %v2751_v19, %v911_v27  ;;  %vm944_vm0 = vcmp.ge.s32.totalorder %v927_v28, %v2762_v24  ;;  %vm961_vm1 = vcmp.lt.s32.totalorder %v927_v28, %v2765_v25  ;;  %v929_v40 = vadd.s32 %v2751_v19, %v912_v29  ;;  %p997_p0 = scmp.eq.s32.totalorder %s3374_s18, 0  ;;  %v2861_v63 = vld [vmem:[#allocation2 + $0x78] sm:$0xff]  ;;  %v1001_v8 = vld [vmem:[%s2657_s23 + $0x8] sm:$0xff]  ;;  %v1018_v14 = vld [vmem:[%s2682_s20 + $0x10] sm:$0xff] }
 0x27c   : > { %p994_p5 = scmp.gt.s32.totalorder %s1616_s30, 0  ;;  %vm2794_vm2 = vmand %vm944_vm0, %vm961_vm1  ;;  %v930_v42 = vadd.s32 %v2751_v19, %v913_v30  ;;  %v931_v44 = vadd.s32 %v2751_v19, %v914_v37  ;;  %v2803_v45 = vadd.s32 %v2751_v19, %v915_v38  ;;  %v916_v57 = vadd.s32 48, %v2753_v20  ;;  %v1017_v10 = vld [vmem:[%s2682_s20 + $0x8] sm:$0xff]  ;;  %v1003_v13 = vld [vmem:[%s2657_s23 + $0x18] sm:$0xff] }
 0x27d   : > { %vm945_vm3 = vcmp.ge.s32.totalorder %v928_v39, %v2762_v24  ;;  %vm962_vm4 = vcmp.lt.s32.totalorder %v928_v39, %v2765_v25  ;;  %vm1131_vm5 = vmpackc.low %vm2794_vm2, %vm2794_vm2  ;;  %vm946_vm6 = vcmp.ge.s32.totalorder %v929_v40, %v2762_v24  ;;  %vm963_vm7 = vcmp.lt.s32.totalorder %v929_v40, %v2765_v25  ;;  %v1019_v15 = vld [vmem:[%s2682_s20 + $0x18] sm:$0xff]  ;;  %v2929_v38 = vld [vmem:[#allocation2 + $0x40] sm:$0xff] }
 0x27e   : > { %s3446_s30 = smov (!%p994_p5, %s1616_s30), 0  ;;  %vm978_vm8 = vmand %vm945_vm3, %vm962_vm4  ;;  %v1147_v51 = vsel %vm1131_vm5, 65537, %v2249_v50  ;;  %vm947_vm9 = vcmp.ge.s32.totalorder %v930_v42, %v2762_v24  ;;  %vm964_vm10 = vcmp.lt.s32.totalorder %v930_v42, %v2765_v25  ;;  %vm948_vm11 = vcmp.ge.s32.totalorder %v931_v44, %v2762_v24  ;;  %v2911_v28 = vld [vmem:[#allocation2 + $0x38] sm:$0xff]  ;;  %v1004_v41 = vld [vmem:[%s2657_s23 + $0x20] sm:$0xff] }
 0x27f   : > { %s2780_s19 = sld [smem:[#allocation4 + %s3446_s30]]  ;;  %vm1132_vm12 = vmpackc.low %vm978_vm8, %vm978_vm8  ;;  %vm949_vm13 = vcmp.ge.s32.totalorder %v2803_v45, %v2762_v24  ;;  %vm965_vm14 = vcmp.lt.s32.totalorder %v931_v44, %v2765_v25  ;;  %vm966_vm15 = vcmp.lt.s32.totalorder %v2803_v45, %v2765_v25  ;;  %v917_v58 = vadd.s32 56, %v2753_v20  ;;  %v2927_v37 = vld [vmem:[#allocation2 + $0x58] sm:$0xff]  ;;  %v1005_v42 = vld [vmem:[%s2657_s23 + $0x28] sm:$0xff] }
 0x280   : > { %v1148_v54 = vsel %vm1132_vm12, 65537, %v2249_v50  ;;  %vm2841_vm0 = vmand %vm946_vm6, %vm963_vm7  ;;  %v1089_v0 = vpack.c.bf16 %v2851_v60, %v2832_v53  ;;  %v918_v1 = vadd.s32 64, %v2753_v20  ;;  %v919_v2 = vadd.s32 72, %v2753_v20  ;;  %v2947_v44 = vld [vmem:[#allocation2 + $0xc8] sm:$0xff]  ;;  %v1020_v45 = vld [vmem:[%s2682_s20 + $0x20] sm:$0xff] }
 0x281   : > { %v1617_v61 = vcombine.low %v1147_v51, %v1148_v54  ;;  %vm2857_vm1 = vmand %vm947_vm9, %vm964_vm10  ;;  %v933_v3 = vadd.s32 %v2751_v19, %v916_v57  ;;  %v934_v4 = vadd.s32 %v2751_v19, %v917_v58  ;;  %v1090_v5 = vpack.c.bf16 %v2861_v63, %v2849_v59  ;;  %v1021_v54 = vld [vmem:[%s2682_s20 + $0x28] sm:$0xff]  ;;  %v1022_v62 = vld [vmem:[%s2682_s20 + $0x30] sm:$0xff] }
 0x282   : > { %vm1133_vm2 = vmpackc.low %vm2841_vm0, %vm2841_vm0  ;;  %v2884_v6 = vadd.s32 80, %v2753_v20  ;;  %v935_v17 = vadd.s32 %v2751_v19, %v918_v1  ;;  %v2909_v27 = vadd.s32 %v2751_v19, %v919_v2  ;;  %v1008_v21 = vld [vmem:[%s2657_s23 + $0x40] sm:$0xff]  ;;  %v1009_v22 = vld [vmem:[%s2657_s23 + $0x48] sm:$0xff]  ;;  %v3398_v60 = vpack.c.bf16 %v2929_v38, %v2911_v28 }
 0x283   : > { %vm2890_vm3 = vcmp.ne.s16.totalorder %v1617_v61, 0  ;;  %vm1134_vm4 = vmpackc.low %vm2857_vm1, %vm2857_vm1  ;;  %v1149_v16 = vsel %vm1133_vm2, 65537, %v2249_v50  ;;  %vm950_vm6 = vcmp.ge.s32.totalorder %v933_v3, %v2762_v24  ;;  %vm951_vm7 = vcmp.ge.s32.totalorder %v934_v4, %v2762_v24  ;;  %v1006_v61 = vld [vmem:[%s2657_s23 + $0x30] sm:$0xff]  ;;  %v1025_v35 = vld [vmem:[%s2682_s20 + $0x48] sm:$0xff] }
 0x284   : > { %v1150_v29 = vsel %vm1134_vm4, 65537, %v2249_v50  ;;  %vm2920_vm5 = vmand %vm948_vm11, %vm965_vm14  ;;  %vm967_vm8 = vcmp.lt.s32.totalorder %v933_v3, %v2765_v25  ;;  %vm968_vm10 = vcmp.lt.s32.totalorder %v934_v4, %v2765_v25  ;;  %vm952_vm11 = vcmp.ge.s32.totalorder %v935_v17, %v2762_v24  ;;  %v1023_v4 = vld [vmem:[%s2682_s20 + $0x38] sm:$0xff]  ;;  %v1073_v38 = vld [vmem:[#allocation2 + $0x70] sm:$0xff] }
 0x285   : > { %p998_p6 = scmp.ne.s32.totalorder %s2780_s19, %s2669_s9  ;;  %v1618_v39 = vcombine.low %v1149_v16, %v1150_v29  ;;  %vm2937_vm9 = vmand %vm949_vm13, %vm966_vm15  ;;  %vm953_vm12 = vcmp.ge.s32.totalorder %v2909_v27, %v2762_v24  ;;  %vm969_vm14 = vcmp.lt.s32.totalorder %v935_v17, %v2765_v25  ;;  %vm970_vm15 = vcmp.lt.s32.totalorder %v2909_v27, %v2765_v25  ;;  %v1027_v53 = vld [vmem:[%s2682_s20 + $0x58] sm:$0xff] }
 0x286   : > { %vm1135_vm13 = vmpackc.low %vm2920_vm5, %vm2920_vm5  ;;  %v3399_v63 = vpack.c.bf16 %v2947_v44, %v2927_v37  ;;  %v1072_v37 = vld [vmem:[#allocation2 + $0x90] sm:$0xff]  ;;  %v1074_v44 = vld [vmem:[#allocation2 + $0xc0] sm:$0xff] }
 0x287   : > { %p2872_p9 = por %p998_p6, %p997_p0  ;;  %vm2962_vm1 = vcmp.ne.s16.totalorder %v1618_v39, 0  ;;  %vm1136_vm2 = vmpackc.low %vm2937_vm9, %vm2937_vm9  ;;  %v1151_v58 = vsel %vm1135_vm13, 65537, %v2249_v50 }
 0x288   : > { %vm2986_vm4 = vmand %vm950_vm6, %vm967_vm8 }
 0x289   : > { %s1032_s14 = scalar_select %p2872_p9, 1, 0  ;;  %vm2994_vm5 = vmand %vm951_vm7, %vm968_vm10 }
 0x28a   : > { %vm1137_vm6 = vmpackc.low %vm2986_vm4, %vm2986_vm4 }
 0x28b   : > { %v2949_v51 = vstv %s1032_s14  ;;  %vm1138_vm7 = vmpackc.low %vm2994_vm5, %vm2994_vm5 }
 0x28c   : > { %vm1034_vm0 = vcmp.eq.s32.totalorder %v2949_v51, 1  ;;  %vm3058_vm8 = vmand %vm953_vm12, %vm970_vm15  ;;  %v1154_v27 = vsel %vm1138_vm7, 65537, %v2249_v50 }
 0x28d   : > { %v1035_v2 = vsel %vm1034_vm0, %v1000_v7, %v1016_v9  ;;  %v1036_v16 = vsel %vm1034_vm0, %v1001_v8, %v1017_v10  ;;  %v1037_v29 = vsel %vm1034_vm0, %v1002_v12, %v1018_v14  ;;  %v1038_v30 = vsel %vm1034_vm0, %v1003_v13, %v1019_v15  ;;  %v1007_v13 = vld [vmem:[%s2657_s23 + $0x38] sm:$0xff] }
 0x28e   : > { %v1625_v1 = vcombine.low %v1035_v2, %v1036_v16  ;;  %v1626_v55 = vcombine.high %v1035_v2, %v1036_v16  ;;  %v1627_v7 = vcombine.low %v1037_v29, %v1038_v30  ;;  %v1628_v8 = vcombine.high %v1037_v29, %v1038_v30  ;;  %v1011_v9 = vld [vmem:[%s2657_s23 + $0x58] sm:$0xff] }
 0x28f   : > { %v1039_v3 = vsel %vm1034_vm0, %v1004_v41, %v1020_v45  ;;  %v1040_v10 = vsel %vm1034_vm0, %v1005_v42, %v1021_v54  ;;  %v1152_v12 = vsel %vm1136_vm2, 65537, %v2249_v50  ;;  %v1041_v14 = vsel %vm1034_vm0, %v1006_v61, %v1022_v62 }
 0x290   : > { %v1275_v15 = vsel %vm2890_vm3, %v1083_v26, %v1625_v1  ;;  %v1276_v40 = vsel %vm2890_vm3, %v1084_v34, %v1626_v55  ;;  %v1277_v41 = vsel %vm2962_vm1, %v1085_v36, %v1627_v7  ;;  %v1278_v18 = vsel %vm2962_vm1, %v1086_v43, %v1628_v8  ;;  %vm3044_vm3 = vmand %vm952_vm11, %vm969_vm14  ;;  %v1024_v34 = vld [vmem:[%s2682_s20 + $0x40] sm:$0xff] }
 0x291   : > { %v1641_v23 = vcombine.low %v1275_v15, %v1276_v40  ;;  %v1642_v26 = vcombine.high %v1275_v15, %v1276_v40  ;;  %v1643_v31 = vcombine.low %v1277_v41, %v1278_v18  ;;  %v1644_v33 = vcombine.high %v1277_v41, %v1278_v18  ;;  %vm1139_vm9 = vmpackc.low %vm3044_vm3, %vm3044_vm3  ;;  %v1013_v15 = vld [vmem:[%s2657_s23 + $0x68] sm:$0xff] }
 0x292   : > { %v1619_v36 = vcombine.low %v1151_v58, %v1152_v12  ;;  %v1629_v43 = vcombine.low %v1039_v3, %v1040_v10  ;;  %v1630_v11 = vcombine.high %v1039_v3, %v1040_v10  ;;  %v1042_v42 = vsel %vm1034_vm0, %v1007_v13, %v1023_v4  ;;  %vm1140_vm11 = vmpackc.low %vm3058_vm8, %vm3058_vm8  ;;  %v1026_v3 = vld [vmem:[%s2682_s20 + $0x50] sm:$0xff]  ;;  %v1071_v4 = vld [vmem:[#allocation2 + $0xe0] sm:$0xff] }
 0x293   : > { %1371 = vst [vmem:[%s2682_s20] sm:$0xff] %v1641_v23  ;;  %1372 = vst [vmem:[%s2682_s20 + $0x8] sm:$0xff] %v1642_v26  ;;  %v1153_v45 = vsel %vm1137_vm6, 65537, %v2249_v50  ;;  %v1631_v54 = vcombine.low %v1041_v14, %v1042_v42  ;;  %v1632_v55 = vcombine.high %v1041_v14, %v1042_v42  ;;  %v1043_v58 = vsel %vm1034_vm0, %v1008_v21, %v1024_v34  ;;  %v1012_v14 = vld [vmem:[%s2657_s23 + $0x60] sm:$0xff] }
 0x294   : > { %1373 = vst [vmem:[%s2682_s20 + $0x10] sm:$0xff] %v1643_v31  ;;  %1374 = vst [vmem:[%s2682_s20 + $0x18] sm:$0xff] %v1644_v33  ;;  %vm1189_vm10 = vcmp.ne.s16.totalorder %v1619_v36, 0  ;;  %v1620_v57 = vcombine.low %v1153_v45, %v1154_v27  ;;  %v1044_v61 = vsel %vm1034_vm0, %v1009_v22, %v1025_v35  ;;  %v1155_v2 = vsel %vm1139_vm9, 65537, %v2249_v50  ;;  %v1028_v21 = vld [vmem:[%s2682_s20 + $0x60] sm:$0xff]  ;;  %v1029_v22 = vld [vmem:[%s2682_s20 + $0x68] sm:$0xff] }
 0x295   : > { %v1279_v62 = vsel %vm1189_vm10, %v1087_v52, %v1629_v43  ;;  %v1280_v1 = vsel %vm1189_vm10, %v1088_v56, %v1630_v11  ;;  %v1156_v16 = vsel %vm1140_vm11, 65537, %v2249_v50  ;;  %v1633_v48 = vcombine.low %v1043_v58, %v1044_v61  ;;  %v1010_v52 = vld [vmem:[%s2657_s23 + $0x50] sm:$0xff]  ;;  %v1075_v36 = vld [vmem:[#allocation2 + $0xa8] sm:$0xff] }
 0x296   : > { %v1645_v29 = vcombine.low %v1279_v62, %v1280_v1  ;;  %v1646_v30 = vcombine.high %v1279_v62, %v1280_v1  ;;  %vm1190_vm12 = vcmp.ne.s16.totalorder %v1620_v57, 0  ;;  %v1621_v39 = vcombine.low %v1155_v2, %v1156_v16  ;;  %v1077_v43 = vld [vmem:[#allocation2 + $0x10] sm:$0xff]  ;;  %v1015_v2 = vld [vmem:[%s2657_s23 + $0x78] sm:$0xff] }
 0x297   : > { %v1281_v46 = vsel %vm1190_vm12, %v1089_v0, %v1631_v54  ;;  %v1282_v47 = vsel %vm1190_vm12, %v1090_v5, %v1632_v55  ;;  %v1634_v49 = vcombine.high %v1043_v58, %v1044_v61  ;;  %v921_v8 = vadd.s32 88, %v2753_v20  ;;  %v1076_v27 = vld [vmem:[#allocation2 + $0xd0] sm:$0xff]  ;;  %v1078_v54 = vld [vmem:[#allocation2 + $0x28] sm:$0xff] }
 0x298   : > { %1375 = vst [vmem:[%s2682_s20 + $0x20] sm:$0xff] %v1645_v29  ;;  %1376 = vst [vmem:[%s2682_s20 + $0x28] sm:$0xff] %v1646_v30  ;;  %v1647_v56 = vcombine.low %v1281_v46, %v1282_v47  ;;  %v1648_v7 = vcombine.high %v1281_v46, %v1282_v47  ;;  %vm1191_vm13 = vcmp.ne.s16.totalorder %v1621_v39, 0  ;;  %v937_v5 = vadd.s32 %v2751_v19, %v2884_v6  ;;  %v1014_v1 = vld [vmem:[%s2657_s23 + $0x70] sm:$0xff]  ;;  %v1031_v47 = vld [vmem:[%s2682_s20 + $0x78] sm:$0xff] }
 0x299   : > { %v1283_v59 = vsel %vm1191_vm13, %v3398_v60, %v1633_v48  ;;  %v1284_v0 = vsel %vm1191_vm13, %v3399_v63, %v1634_v49  ;;  %v938_v13 = vadd.s32 %v2751_v19, %v921_v8  ;;  %v1045_v28 = vsel %vm1034_vm0, %v1010_v52, %v1026_v3  ;;  %v1030_v46 = vld [vmem:[%s2682_s20 + $0x70] sm:$0xff]  ;;  %v1081_v8 = vld [vmem:[#allocation2 + $0x20] sm:$0xff]  ;;  %v1080_v60 = vld [vmem:[#allocation2 + $0xf8] sm:$0xff] }
 0x29a   : > { %1377 = vst [vmem:[%s2682_s20 + $0x30] sm:$0xff] %v1647_v56  ;;  %1378 = vst [vmem:[%s2682_s20 + $0x38] sm:$0xff] %v1648_v7  ;;  %v1649_v10 = vcombine.low %v1283_v59, %v1284_v0  ;;  %v1650_v12 = vcombine.high %v1283_v59, %v1284_v0  ;;  %vm954_vm14 = vcmp.ge.s32.totalorder %v937_v5, %v2762_v24  ;;  %v922_v41 = vadd.s32 96, %v2753_v20  ;;  %v1079_v7 = vld [vmem:[#allocation2 + $0xa0] sm:$0xff]  ;;  %v1082_v59 = vld [vmem:[#allocation2 + $0x98] sm:$0xff] }
 0x29b   : > { %vm971_vm15 = vcmp.lt.s32.totalorder %v937_v5, %v2765_v25  ;;  %v1046_v6 = vsel %vm1034_vm0, %v1011_v9, %v1027_v53  ;;  %vm955_vm1 = vcmp.ge.s32.totalorder %v938_v13, %v2762_v24  ;;  %vm972_vm2 = vcmp.lt.s32.totalorder %v938_v13, %v2765_v25 }
 0x29c   : > { %1379 = vst [vmem:[%s2682_s20 + $0x40] sm:$0xff] %v1649_v10  ;;  %1380 = vst [vmem:[%s2682_s20 + $0x48] sm:$0xff] %v1650_v12  ;;  %v923_v18 = vadd.s32 104, %v2753_v20  ;;  %v1093_v23 = vpack.c.bf16 %v1073_v38, %v1071_v4  ;;  %v1094_v26 = vpack.c.bf16 %v1074_v44, %v1072_v37  ;;  %v1635_v31 = vcombine.low %v1045_v28, %v1046_v6 }
 0x29d   : > { %vm987_vm4 = vmand %vm954_vm14, %vm971_vm15  ;;  %v1636_v33 = vcombine.high %v1045_v28, %v1046_v6  ;;  %v939_v34 = vadd.s32 %v2751_v19, %v922_v41  ;;  %v924_v11 = vadd.s32 112, %v2753_v20  ;;  %v1047_v17 = vsel %vm1034_vm0, %v1012_v14, %v1028_v21 }
 0x29e   : > { %vm3132_vm5 = vmand %vm955_vm1, %vm972_vm2  ;;  %v940_v35 = vadd.s32 %v2751_v19, %v923_v18  ;;  %v1048_v45 = vsel %vm1034_vm0, %v1013_v15, %v1029_v22  ;;  %v925_v55 = vadd.s32 120, %v2753_v20  ;;  %v1095_v61 = vpack.c.bf16 %v1077_v43, %v1075_v36 }
 0x29f   : > { %vm1141_vm6 = vmpackc.low %vm987_vm4, %vm987_vm4  ;;  %vm956_vm3 = vcmp.ge.s32.totalorder %v939_v34, %v2762_v24  ;;  %vm973_vm9 = vcmp.lt.s32.totalorder %v939_v34, %v2765_v25  ;;  %v941_v62 = vadd.s32 %v2751_v19, %v924_v11  ;;  %v1096_v29 = vpack.c.bf16 %v1078_v54, %v1076_v27 }
 0x2a0   : > { %vm1142_vm7 = vmpackc.low %vm3132_vm5, %vm3132_vm5  ;;  %v1157_v32 = vsel %vm1141_vm6, 65537, %v2249_v50  ;;  %vm957_vm8 = vcmp.ge.s32.totalorder %v940_v35, %v2762_v24  ;;  %vm974_vm10 = vcmp.lt.s32.totalorder %v940_v35, %v2765_v25  ;;  %v942_v20 = vadd.s32 %v2751_v19, %v925_v55 }
 0x2a1   : > { %v1158_v42 = vsel %vm1142_vm7, 65537, %v2249_v50  ;;  %vm3157_vm11 = vmand %vm956_vm3, %vm973_vm9  ;;  %v1637_v30 = vcombine.low %v1047_v17, %v1048_v45  ;;  %v1638_v39 = vcombine.high %v1047_v17, %v1048_v45  ;;  %vm958_vm15 = vcmp.ge.s32.totalorder %v941_v62, %v2762_v24 }
 0x2a2   : > { %v1622_v57 = vcombine.low %v1157_v32, %v1158_v42  ;;  %vm3165_vm13 = vmand %vm957_vm8, %vm974_vm10  ;;  %vm959_vm1 = vcmp.ge.s32.totalorder %v942_v20, %v2762_v24  ;;  %vm975_vm4 = vcmp.lt.s32.totalorder %v941_v62, %v2765_v25  ;;  %vm976_vm5 = vcmp.lt.s32.totalorder %v942_v20, %v2765_v25 }
 0x2a3   : > { %vm1143_vm14 = vmpackc.low %vm3157_vm11, %vm3157_vm11  ;;  %v1049_v3 = vsel %vm1034_vm0, %v1014_v1, %v1030_v46  ;;  %v1050_v53 = vsel %vm1034_vm0, %v1015_v2, %v1031_v47  ;;  %v1097_v0 = vpack.c.bf16 %v1081_v8, %v1079_v7  ;;  %v1098_v25 = vpack.c.bf16 %v1082_v59, %v1080_v60 }
 0x2a4   : > { %vm1192_vm12 = vcmp.ne.s16.totalorder %v1622_v57, 0  ;;  %vm1144_vm2 = vmpackc.low %vm3165_vm13, %vm3165_vm13  ;;  %v1159_v56 = vsel %vm1143_vm14, 65537, %v2249_v50  ;;  %v1639_v51 = vcombine.low %v1049_v3, %v1050_v53  ;;  %v1640_v4 = vcombine.high %v1049_v3, %v1050_v53 }
 0x2a5   : > { %v1285_v48 = vsel %vm1192_vm12, %v1093_v23, %v1635_v31  ;;  %v1286_v49 = vsel %vm1192_vm12, %v1094_v26, %v1636_v33  ;;  %v1160_v9 = vsel %vm1144_vm2, 65537, %v2249_v50  ;;  %vm991_vm6 = vmand %vm958_vm15, %vm975_vm4 }
 0x2a6   : > { %v1651_v19 = vcombine.low %v1285_v48, %v1286_v49  ;;  %v1652_v52 = vcombine.high %v1285_v48, %v1286_v49  ;;  %v1623_v63 = vcombine.low %v1159_v56, %v1160_v9  ;;  %vm992_vm7 = vmand %vm959_vm1, %vm976_vm5 }
 0x2a7   : > { %vm1145_vm3 = vmpackc.low %vm991_vm6, %vm991_vm6 }
 0x2a8   : > { %1381 = vst [vmem:[%s2682_s20 + $0x50] sm:$0xff] %v1651_v19  ;;  %1382 = vst [vmem:[%s2682_s20 + $0x58] sm:$0xff] %v1652_v52  ;;  %vm1193_vm8 = vcmp.ne.s16.totalorder %v1623_v63, 0  ;;  %v1161_v5 = vsel %vm1145_vm3, 65537, %v2249_v50 }
 0x2a9   : > { %vm1146_vm9 = vmpackc.low %vm992_vm7, %vm992_vm7  ;;  %v1287_v10 = vsel %vm1193_vm8, %v1095_v61, %v1637_v30  ;;  %v1288_v12 = vsel %vm1193_vm8, %v1096_v29, %v1638_v39 }
 0x2aa   : > { %v1162_v13 = vsel %vm1146_vm9, 65537, %v2249_v50  ;;  %v1653_v28 = vcombine.low %v1287_v10, %v1288_v12  ;;  %v1654_v24 = vcombine.high %v1287_v10, %v1288_v12 }
 0x2ab   : > { %v1624_v6 = vcombine.low %v1161_v5, %v1162_v13 }
 0x2ac   : > { %1383 = vst [vmem:[%s2682_s20 + $0x60] sm:$0xff] %v1653_v28  ;;  %1384 = vst [vmem:[%s2682_s20 + $0x68] sm:$0xff] %v1654_v24 }
 0x2ad   : > { %vm1194_vm0 = vcmp.ne.s16.totalorder %v1624_v6, 0 }
 0x2ae   : > { %v1289_v37 = vsel %vm1194_vm0, %v1097_v0, %v1639_v51  ;;  %v1290_v38 = vsel %vm1194_vm0, %v1098_v25, %v1640_v4 }
 0x2af   : > { %v1655_v44 = vcombine.low %v1289_v37, %v1290_v38  ;;  %v1656_v14 = vcombine.high %v1289_v37, %v1290_v38 }
 0x2b1   : > { %1385 = vst [vmem:[%s2682_s20 + $0x70] sm:$0xff] %v1655_v44  ;;  %1386 = vst [vmem:[%s2682_s20 + $0x78] sm:$0xff] %v1656_v14 }
 0x2b2 PF: > { %s3406_s3 = sld [smem:[#allocation35_spill]]  ;;  %s1405_s2 = sshll.u32 %s2682_s20, 4  ;;  %s3203_s2 = int_to_ptr.vmem [resolvable:$true] %s1405_s2 }
 0x2b3   : > { %s3408_s23 = sld [smem:[#allocation32_spill]]  ;;  %s3212_s24 = scalar_lea.sflag [#allocation11], %s338_s12 }
 0x2b4   : > { %s3410_s15 = sld [smem:[#allocation40_spill]]  ;;  %s2075_s28 = scalar_lea.vmem %s3203_s2, 2048 }
 0x2b5   : > { %p2076_p4 = scmp.ne.s32.totalorder %s3203_s2, %s2075_s28  ;;  %s2250_s20 = smov [#allocation15]  }
 0x2b6   : > { %s2079_s18 = sshll.u32 %s2250_s20, 4  ;;  %s2080_s18 = int_to_ptr.vmem [resolvable:$false] %s2079_s18 }
 0x2b7   : > { %s2081_s30 = scalar_lea.vmem %s2080_s18, 4096  ;;  %p2082_p12 = scmp.lt.s32.totalorder %s3203_s2, %s2080_s18 }
 0x2b8   : > { %p3407_p8 = scmp.ne.s32.totalorder %s3406_s3, 0  ;;  %p2083_p7 = scmp.lt.s32.totalorder %s2081_s30, %s2075_s28 }
 0x2ba   : > { %s1715_s26 = scalar_select %p3407_p8, [#allocation4], [#allocation19] }
 0x2bb   : > { %s3448_s23 = smov (!%p3407_p8, %s3408_s23), 0  ;;  %p2077_p3 = pnand %p2076_p4, %p3407_p8 }
 0x2bc   : > { %s1395_s16 = sld [smem:[%s1715_s26 + %s3448_s23]]  ;;  %p2084_p1 = por %p2083_p7, %p2082_p12 }
 0x2bd   : > { %p2078_p11 = pneg %p2077_p3 }
 0x2bf   : > { %p2085_p2 = pnand %p2084_p1, %p2078_p11 }
 0x2c2   : > { %s1670_s9 = sshll.u32 %s1395_s16, 11 }
 0x2c3   : > { %s3208_s6 = scalar_lea.hbm %s3410_s15, %s1670_s9 }
 0x2c4   : > { %2088 = shalt.err (!%p2085_p2)
}
 0x2c5   : > { %s2089_s12 = scalar_lea.hbm %s3208_s6, 2048  ;;  %s2093_s14 = scalar_lea.hbm %s3410_s15, 4096 }
 0x2c6   : > { %p2090_p10 = scmp.ne.s32.totalorder %s3208_s6, %s2089_s12  ;;  %p2094_p0 = scmp.lt.s32.totalorder %s3208_s6, %s3410_s15 }
 0x2c7   : > { %p2095_p6 = scmp.lt.s32.totalorder %s2093_s14, %s2089_s12 }
 0x2c8   : > { %p2091_p13 = pnand %p2090_p10, %p3407_p8 }
 0x2c9   : > { %p2096_p9 = por %p2095_p6, %p2094_p0 }
 0x2ca   : > { %p2092_p5 = pneg %p2091_p13 }
 0x2cc   : > { %p2097_p4 = pnand %p2096_p9, %p2092_p5 }
 0x2ce   : > { %2100 = shalt.err (!%p2097_p4)
}
 0x2cf   : > { %s2251_s26 = smov 128   ;;  %s2252_s16 = smov 8  }
 0x2d0   : > { %1717 = dma.vmem_to_hbm [thread:$0]  (%p3407_p8), %s3203_s2, 2048, %s3208_s6, %s3212_s24, %s2251_s26, %s2251_s26, %s2252_s16  }
 0x2d1 PF: > { %s3411_s9 = sld [smem:[#allocation28_spill]]  ;;  %p1740_p3 = scmp.ge.s32.totalorder %s2237_s0, 2 }
 0x2d2   : > { %s3412_s25 = sld [smem:[#allocation36_spill]] }
 0x2d7   : > { %s1420_s21 = sand.u32 1, %s3411_s9  }
 0x2d8   : > { %p3413_p11 = scmp.ne.s32.totalorder %s3412_s25, 0  ;;  %s1421_s28 = scalar_lea.sflag [#allocation11], %s1420_s21 }
 0x2da   : > { %p1736_p12 = pnand %p1740_p3, %p3413_p11 }
 0x2dc   : > { %p1737_p7 = pneg %p1736_p12 }
 0x2de   : > { %2176 = dma.done.wait (%p1737_p7), %s1421_s28, 2048  }
 0x2df   : > { %2178 = vsyncadd (%p1737_p7), %s1421_s28, 4294965248  ;;  %s46_s0 = sadd.s32 1, %s2237_s0   ;;  %s3415_s23 = sld [smem:[#allocation29_spill]] }
 0x2e0   : > { %p3240_p1 = scmp.ge.s32.totalorder %s46_s0, 8   ;;  %s3416_s24 = sld [smem:[#allocation30_spill]] }
 0x2e1   : > { %s3417_s25 = sld [smem:[#allocation38_spill]]  ;;  %s3421_s26 = smov %s2197_s27 }
 0x2e2   : > { %s3418_s3 = sld [smem:[#allocation31_spill]]  ;;  %s3422_s27 = smov %s2201_s4 }
 0x2e3   : > { %s3419_s30 = sld [smem:[#allocation37_spill]]  ;;  %s3423_s4 = smov %s2593_s17 }
 0x2e4   : > { %s3420_s2 = sld [smem:[#allocation33_spill]]  ;;  %s3424_s28 = smov %s2209_s29 }
 0x2e5   : > { %s3426_s9 = smov %s2221_s10  ;;  %s3427_s10 = smov %s2225_s11 }
 0x2e6   : > { %s3428_s11 = smov %s2521_s22  ;;  %s3429_s12 = smov %s2233_s13 }
 0x2e7   :  { %45 = sbr.rel (!%p3240_p1) target bundleno = 60 (0x3c), region = 113 }
 0x2e8   : > { %s3425_s29 = smov %s3418_s3 }
 0x2ea   : > { %s3430_s13 = smov %s3420_s2 }
 0x2ec   :  { %1426 = vsyncpa [#allocation10], 1 }
 0x2ed   :  { %1428 = vsyncpa [#allocation10 + $0x1], 1 }
 0x2ee   :  { %1429 = vsyncpa [#allocation13], 1 }
 0x2ef   :  { %1431 = vsyncpa [#allocation13 + $0x1], 1 }
 0x2f0   :  { %1432 = vsyncpa [#allocation11], 1 }
 0x2f1   :  { %1434 = vsyncpa [#allocation11 + $0x1], 1 }

</bundles_post_ra>
